<compile_context>
chip_gen: v7x
topology: tpu7x:2x2x1
jax: 0.10.0
libtpu: 0.0.40
codegen_flags: <defaults>
</compile_context>

<pallas_src>
import math
import functools

import jax
import jax.numpy as jnp
from jax.experimental import pallas as pl
from jax.experimental.pallas import tpu as pltpu

LANES = 128  # lane-dense padded feature width


# ----------------------------- Pallas kernels ------------------------------ #

def _gcn_block1_kernel(ahat_ref, araw_ref, x_ref,
                       w1_ref, b1_ref, w2_ref, b2_ref, w3_ref, b3_ref,
                       wsag_ref, bsag_ref, o_ref, *, fout):
    """conv1..conv3 (+folded BN, tanh) and fused SAG1 scorer.

    All feature dims are zero-padded to LANES; the tanh'ed SAG score is packed
    into lane `fout` of the output (that lane is guaranteed zero in h).
    """
    f32 = jnp.float32
    ahat = ahat_ref[...]

    # conv1: fin(7) < fout(32) -> aggregate first: (A @ X) @ W1
    h = jnp.dot(ahat, x_ref[...], preferred_element_type=f32)
    h = jnp.tanh(jnp.dot(h, w1_ref[...], preferred_element_type=f32) + b1_ref[...])

    # conv2 (+BN2 folded, tanh)
    h = jnp.dot(ahat, jnp.dot(h, w2_ref[...], preferred_element_type=f32),
                preferred_element_type=f32) + b2_ref[...]
    h = jnp.tanh(h)

    # conv3 (+BN3 folded, tanh)
    h = jnp.dot(ahat, jnp.dot(h, w3_ref[...], preferred_element_type=f32),
                preferred_element_type=f32) + b3_ref[...]
    h = jnp.tanh(h)

    # SAG1 scorer (GraphConv fin->1, tanh): wsag = [w_rel | w_root]  (fin_pad, 2)
    sc = jnp.dot(h, wsag_ref[...], preferred_element_type=f32)        # (N, 2)
    agg = jnp.dot(araw_ref[...], sc, preferred_element_type=f32)      # (N, 2)
    score = jnp.tanh(agg[:, 0:1] + sc[:, 1:2] + bsag_ref[...])        # (N, 1)

    # pack score into lane `fout` (zero in h) -> single lane-dense store
    lane = jax.lax.broadcasted_iota(jnp.int32, h.shape, 1)
    o_ref[...] = (h + jnp.where(lane == fout, score, 0.0)).astype(o_ref.dtype)


def _gcn_block2_kernel(ahat_ref, araw_ref, x_ref,
                       w4_ref, b4_ref, w5_ref, b5_ref,
                       wsag_ref, bsag_ref, o_ref, *, fout):
    """conv4 (+folded BN4, tanh), conv5 (no BN/act) and fused SAG2 scorer."""
    f32 = jnp.float32
    ahat = ahat_ref[...]

    # conv4 (+BN4 folded, tanh)
    h = jnp.dot(ahat, jnp.dot(x_ref[...], w4_ref[...], preferred_element_type=f32),
                preferred_element_type=f32) + b4_ref[...]
    h = jnp.tanh(h)

    # conv5 (no BN, no activation)
    h = jnp.dot(ahat, jnp.dot(h, w5_ref[...], preferred_element_type=f32),
                preferred_element_type=f32) + b5_ref[...]

    # SAG2 scorer
    sc = jnp.dot(h, wsag_ref[...], preferred_element_type=f32)
    agg = jnp.dot(araw_ref[...], sc, preferred_element_type=f32)
    score = jnp.tanh(agg[:, 0:1] + sc[:, 1:2] + bsag_ref[...])

    lane = jax.lax.broadcasted_iota(jnp.int32, h.shape, 1)
    o_ref[...] = (h + jnp.where(lane == fout, score, 0.0)).astype(o_ref.dtype)


# ----------------------------- kernel wrappers ------------------------------ #

def _full_spec(shape):
    # whole-array block on a trivial grid
    return pl.BlockSpec(shape, lambda i: tuple(0 for _ in shape))


def _call_block(kernel, operands, n_rows):
    return pl.pallas_call(
        kernel,
        out_shape=jax.ShapeDtypeStruct((n_rows, LANES), jnp.float32),
        grid=(1,),
        in_specs=[_full_spec(op.shape) for op in operands],
        out_specs=_full_spec((n_rows, LANES)),
        compiler_params=pltpu.CompilerParams(dimension_semantics=("arbitrary",)),
    )(*operands)


def gcn_block1(a_hat, a_raw, x_pad, w1, b1, w2, b2, w3, b3, wsag, bsag, fout):
    kern = functools.partial(_gcn_block1_kernel, fout=fout)
    return _call_block(kern, (a_hat, a_raw, x_pad, w1, b1, w2, b2, w3, b3, wsag, bsag),
                       x_pad.shape[0])


def gcn_block2(a_hat, a_raw, x_pad, w4, b4, w5, b5, wsag, bsag, fout):
    kern = functools.partial(_gcn_block2_kernel, fout=fout)
    return _call_block(kern, (a_hat, a_raw, x_pad, w4, b4, w5, b5, wsag, bsag),
                       x_pad.shape[0])


# ----------------------------- plain-JAX glue ------------------------------- #

def dense_adj(edge_index, num_nodes):
    src, dst = edge_index[0], edge_index[1]
    A = jnp.zeros((num_nodes, num_nodes), jnp.float32)
    return A.at[dst, src].add(1.0)          # A[target, source]


def gcn_norm(A):
    n = A.shape[0]
    At = A + jnp.eye(n, dtype=A.dtype)      # add self loops
    deg = At.sum(axis=1)                    # degree incl. self loop
    dinv = jax.lax.rsqrt(deg)
    return dinv[:, None] * At * dinv[None, :]


def fold_bn(w, b, gamma, beta, eps=1e-5):
    # eval-mode BN (running_mean=0, running_var=1) folded into the conv linear:
    # BN(X W + b) == X (W*scale) + (b*scale + beta)
    scale = gamma / jnp.sqrt(1.0 + eps)
    return w * scale[None, :], b * scale + beta


def pad2(a, rows, cols):
    r, c = a.shape
    return jnp.pad(a, ((0, rows - r), (0, cols - c)))


def topk_per_graph(score, num_graphs, nodes_per_graph, k):
    # assumes nodes are contiguous and equal-sized per graph
    s = score.reshape(num_graphs, nodes_per_graph)
    _, idx = jax.lax.top_k(s, k)                       # descending per graph
    offsets = (jnp.arange(num_graphs) * nodes_per_graph)[:, None]
    return (idx + offsets).reshape(-1)


# ----------------------------- full forward --------------------------------- #

@functools.partial(jax.jit, static_argnums=(4, 5))
def gcn_forward(x, edge_index, batch, P, num_graphs, nodes_per_graph):
    del batch  # graphs are contiguous & equal-sized; batch only groups nodes for top-k
    x = x.astype(jnp.float32)
    N = num_graphs * nodes_per_graph
    A_raw = dense_adj(edge_index.astype(jnp.int32), N)
    A_hat = gcn_norm(A_raw)

    # ---- fold BN into the conv weights, pad everything to 128 lanes ----
    w1, b1 = fold_bn(P["conv1_w"], P["conv1_b"], P["bn1_gamma"], P["bn1_beta"])
    w2, b2 = fold_bn(P["conv2_w"], P["conv2_b"], P["bn2_gamma"], P["bn2_beta"])
    w3, b3 = fold_bn(P["conv3_w"], P["conv3_b"], P["bn3_gamma"], P["bn3_beta"])
    w4, b4 = fold_bn(P["conv4_w"], P["conv4_b"], P["bn4_gamma"], P["bn4_beta"])
    w5, b5 = P["conv5_w"], P["conv5_b"]      # conv5: no BN, no activation

    def wp(w):
        return pad2(w, LANES, LANES)

    def bp(b):
        return pad2(b.reshape(1, -1), 1, LANES)

    wsag1 = pad2(jnp.concatenate([P["sag1_wrel"], P["sag1_wroot"]], axis=1), LANES, 2)
    wsag2 = pad2(jnp.concatenate([P["sag2_wrel"], P["sag2_wroot"]], axis=1), LANES, 2)
    bsag1 = P["sag1_brel"].reshape(1, 1)
    bsag2 = P["sag2_brel"].reshape(1, 1)

    x_pad = pad2(x, N, LANES)

    # ---- fused block 1: conv1..conv3 (+BN, tanh) + SAG1 score ----
    out1 = gcn_block1(A_hat, A_raw, x_pad,
                      wp(w1), bp(b1), wp(w2), bp(b2), wp(w3), bp(b3),
                      wsag1, bsag1, fout=32)
    x3 = out1[:, :32]
    score1 = out1[:, 32]

    # ---- SAGPooling #1 (ratio=0.1): top-k, scale, filter_adj ----
    k1 = max(1, int(math.ceil(0.1 * nodes_per_graph)))
    perm1 = topk_per_graph(score1, num_graphs, nodes_per_graph, k1)
    x1 = x3[perm1] * score1[perm1][:, None]
    A_raw2 = A_raw[perm1][:, perm1]
    A_hat2 = gcn_norm(A_raw2)
    x1_pad = pad2(x1, x1.shape[0], LANES)

    # ---- fused block 2: conv4 (+BN, tanh), conv5 + SAG2 score ----
    out2 = gcn_block2(A_hat2, A_raw2, x1_pad,
                      wp(w4), bp(b4), wp(w5), bp(b5),
                      wsag2, bsag2, fout=64)
    x5 = out2[:, :64]
    score2 = out2[:, 64]

    # ---- SAGPooling #2 (ratio=0.0001) -> returned node features ----
    k2 = max(1, int(math.ceil(0.0001 * k1)))
    perm2 = topk_per_graph(score2, num_graphs, k1, k2)
    return x5[perm2] * score2[perm2][:, None]


# ----------------------------- parameters ----------------------------------- #

def init_params(key):
    keys = iter(jax.random.split(key, 32))

    def nrm(shape, scale=0.1):
        return scale * jax.random.normal(next(keys), shape, jnp.float32)

    P = {}
    # GCNConv weights (Linear without bias inside; bias added after aggregation)
    for i, (fi, fo) in enumerate([(7, 32), (32, 32), (32, 32), (32, 64), (64, 64)], 1):
        P[f"conv{i}_w"] = nrm((fi, fo))
        P[f"conv{i}_b"] = nrm((fo,), 0.02)
    # BatchNorm affine params (bn5 exists in the module but is unused in forward)
    for i, f in zip([1, 2, 3, 4, 5], [32, 32, 32, 64, 64]):
        P[f"bn{i}_gamma"] = 1.0 + nrm((f,), 0.05)
        P[f"bn{i}_beta"] = nrm((f,), 0.05)
    # SAGPooling scorers (GraphConv in->1): lin_rel (with bias), lin_root (no bias)
    for name, f in [("sag1", 32), ("sag2", 64)]:
        P[f"{name}_wrel"] = nrm((f, 1))
        P[f"{name}_wroot"] = nrm((f, 1))
        P[f"{name}_brel"] = nrm((1,), 0.02)
    return P


# ----------------------------- main ------------------------------------------ #

if __name__ == "__main__":
    key = jax.random.PRNGKey(0)
    pkey, xkey = jax.random.split(key)
    P = init_params(pkey)

    num_graphs, nodes_per_graph = 4, 16
    N = num_graphs * nodes_per_graph

    # node features [N, 7]
    x = jax.random.normal(xkey, (N, 7), jnp.float32)

    # intra-graph ring edges (both directions) per graph -> edge_index [2, 128]
    src_list, dst_list = [], []
    for g in range(num_graphs):
        base = g * nodes_per_graph
        for i in range(nodes_per_graph):
            a = base + i
            b = base + (i + 1) % nodes_per_graph
            src_list += [a, b]
            dst_list += [b, a]
    edge_index = jnp.array([src_list, dst_list], dtype=jnp.int32)

    # 0-indexed batch vector (contiguous equal-sized graphs)
    batch = jnp.repeat(jnp.arange(num_graphs), nodes_per_graph)

    out = gcn_forward(x, edge_index, batch, P, num_graphs, nodes_per_graph)
    out = jax.block_until_ready(out)

    k1 = max(1, int(math.ceil(0.1 * nodes_per_graph)))
    k2 = max(1, int(math.ceil(0.0001 * k1)))
    assert out.shape == (num_graphs * k2, 64), out.shape
    assert bool(jnp.all(jnp.isfinite(out)))
    print("KERNEL_OK")
</pallas_src>

<mosaic_0001>
module attributes {stable_mosaic.version = 11 : i64} {
  func.func private @main(%arg0: i32) attributes {dimension_semantics = [#tpu.dimension_semantics<core_parallel>], iteration_bounds = array<i64: 2>, tpu.core_type = #tpu.core_type<sc_scalar_subcore>, window_params = []} {
    return
  }
}

module attributes {stable_mosaic.version = 11 : i64} {
  func.func private @main(%arg0: i32) attributes {dimension_semantics = [#tpu.dimension_semantics<core_parallel>], iteration_bounds = array<i64: 2>, tpu.core_type = #tpu.core_type<sc_scalar_subcore>, window_params = []} {
    return
  }
}

module attributes {stable_mosaic.version = 11 : i64} {
  func.func @_gcn_block1_kernel(%arg0: i32, %arg1: memref<64x64xf32, #tpu.memory_space<vmem>>, %arg2: memref<64x64xf32, #tpu.memory_space<vmem>>, %arg3: memref<64x128xf32, #tpu.memory_space<vmem>>, %arg4: memref<128x128xf32, #tpu.memory_space<vmem>>, %arg5: memref<1x128xf32, #tpu.memory_space<vmem>>, %arg6: memref<128x128xf32, #tpu.memory_space<vmem>>, %arg7: memref<1x128xf32, #tpu.memory_space<vmem>>, %arg8: memref<128x128xf32, #tpu.memory_space<vmem>>, %arg9: memref<1x128xf32, #tpu.memory_space<vmem>>, %arg10: memref<128x2xf32, #tpu.memory_space<vmem>>, %arg11: memref<1x1xf32, #tpu.memory_space<vmem>>, %arg12: memref<64x128xf32, #tpu.memory_space<vmem>>) attributes {dimension_semantics = [#tpu.dimension_semantics<arbitrary>], iteration_bounds = array<i64: 1>, scalar_prefetch = 0 : i64, scratch_operands = 0 : i64, tpu.core_type = #tpu.core_type<tc>, window_params = [{pipeline_mode = #tpu.pipeline_mode<synchronous>, transform_indices = @transform_0, window_bounds = array<i64: 64, 64>}, {pipeline_mode = #tpu.pipeline_mode<synchronous>, transform_indices = @transform_1, window_bounds = array<i64: 64, 64>}, {pipeline_mode = #tpu.pipeline_mode<synchronous>, transform_indices = @transform_2, window_bounds = array<i64: 64, 128>}, {pipeline_mode = #tpu.pipeline_mode<synchronous>, transform_indices = @transform_3, window_bounds = array<i64: 128, 128>}, {pipeline_mode = #tpu.pipeline_mode<synchronous>, transform_indices = @transform_4, window_bounds = array<i64: 1, 128>}, {pipeline_mode = #tpu.pipeline_mode<synchronous>, transform_indices = @transform_5, window_bounds = array<i64: 128, 128>}, {pipeline_mode = #tpu.pipeline_mode<synchronous>, transform_indices = @transform_6, window_bounds = array<i64: 1, 128>}, {pipeline_mode = #tpu.pipeline_mode<synchronous>, transform_indices = @transform_7, window_bounds = array<i64: 128, 128>}, {pipeline_mode = #tpu.pipeline_mode<synchronous>, transform_indices = @transform_8, window_bounds = array<i64: 1, 128>}, {pipeline_mode = #tpu.pipeline_mode<synchronous>, transform_indices = @transform_9, window_bounds = array<i64: 128, 2>}, {pipeline_mode = #tpu.pipeline_mode<synchronous>, transform_indices = @transform_10, window_bounds = array<i64: 1, 1>}, {pipeline_mode = #tpu.pipeline_mode<synchronous>, transform_indices = @transform_11, window_bounds = array<i64: 64, 128>}]} {
    %c0 = arith.constant 0 : index
    %c0_0 = arith.constant 0 : index
    %0 = vector.load %arg1[%c0, %c0_0] : memref<64x64xf32, #tpu.memory_space<vmem>>, vector<64x64xf32>
    %c0_1 = arith.constant 0 : index
    %c0_2 = arith.constant 0 : index
    %1 = vector.load %arg3[%c0_1, %c0_2] : memref<64x128xf32, #tpu.memory_space<vmem>>, vector<64x128xf32>
    %cst = arith.constant dense<0.000000e+00> : vector<64x128xf32>
    %2 = tpu.matmul %0, %1, %cst {dimension_numbers = #tpu.dot_dimension_numbers<[1], [0], [0], [1], [0, 0, 1, 1], [], []>} : vector<64x64xf32>, vector<64x128xf32>, vector<64x128xf32> -> vector<64x128xf32>
    %c0_3 = arith.constant 0 : index
    %c0_4 = arith.constant 0 : index
    %3 = vector.load %arg4[%c0_3, %c0_4] : memref<128x128xf32, #tpu.memory_space<vmem>>, vector<128x128xf32>
    %cst_5 = arith.constant dense<0.000000e+00> : vector<64x128xf32>
    %4 = tpu.matmul %2, %3, %cst_5 {dimension_numbers = #tpu.dot_dimension_numbers<[1], [0], [0], [1], [0, 0, 1, 1], [], []>} : vector<64x128xf32>, vector<128x128xf32>, vector<64x128xf32> -> vector<64x128xf32>
    %c0_6 = arith.constant 0 : index
    %c0_7 = arith.constant 0 : index
    %5 = vector.load %arg5[%c0_6, %c0_7] : memref<1x128xf32, #tpu.memory_space<vmem>>, vector<1x128xf32>
    %6 = vector.broadcast %5 : vector<1x128xf32> to vector<64x128xf32>
    %7 = arith.addf %4, %6 : vector<64x128xf32>
    %8 = math.tanh %7 : vector<64x128xf32>
    %c0_8 = arith.constant 0 : index
    %c0_9 = arith.constant 0 : index
    %9 = vector.load %arg6[%c0_8, %c0_9] : memref<128x128xf32, #tpu.memory_space<vmem>>, vector<128x128xf32>
    %cst_10 = arith.constant dense<0.000000e+00> : vector<64x128xf32>
    %10 = tpu.matmul %8, %9, %cst_10 {dimension_numbers = #tpu.dot_dimension_numbers<[1], [0], [0], [1], [0, 0, 1, 1], [], []>} : vector<64x128xf32>, vector<128x128xf32>, vector<64x128xf32> -> vector<64x128xf32>
    %cst_11 = arith.constant dense<0.000000e+00> : vector<64x128xf32>
    %11 = tpu.matmul %0, %10, %cst_11 {dimension_numbers = #tpu.dot_dimension_numbers<[1], [0], [0], [1], [0, 0, 1, 1], [], []>} : vector<64x64xf32>, vector<64x128xf32>, vector<64x128xf32> -> vector<64x128xf32>
    %c0_12 = arith.constant 0 : index
    %c0_13 = arith.constant 0 : index
    %12 = vector.load %arg7[%c0_12, %c0_13] : memref<1x128xf32, #tpu.memory_space<vmem>>, vector<1x128xf32>
    %13 = vector.broadcast %12 : vector<1x128xf32> to vector<64x128xf32>
    %14 = arith.addf %11, %13 : vector<64x128xf32>
    %15 = math.tanh %14 : vector<64x128xf32>
    %c0_14 = arith.constant 0 : index
    %c0_15 = arith.constant 0 : index
    %16 = vector.load %arg8[%c0_14, %c0_15] : memref<128x128xf32, #tpu.memory_space<vmem>>, vector<128x128xf32>
    %cst_16 = arith.constant dense<0.000000e+00> : vector<64x128xf32>
    %17 = tpu.matmul %15, %16, %cst_16 {dimension_numbers = #tpu.dot_dimension_numbers<[1], [0], [0], [1], [0, 0, 1, 1], [], []>} : vector<64x128xf32>, vector<128x128xf32>, vector<64x128xf32> -> vector<64x128xf32>
    %cst_17 = arith.constant dense<0.000000e+00> : vector<64x128xf32>
    %18 = tpu.matmul %0, %17, %cst_17 {dimension_numbers = #tpu.dot_dimension_numbers<[1], [0], [0], [1], [0, 0, 1, 1], [], []>} : vector<64x64xf32>, vector<64x128xf32>, vector<64x128xf32> -> vector<64x128xf32>
    %c0_18 = arith.constant 0 : index
    %c0_19 = arith.constant 0 : index
    %19 = vector.load %arg9[%c0_18, %c0_19] : memref<1x128xf32, #tpu.memory_space<vmem>>, vector<1x128xf32>
    %20 = vector.broadcast %19 : vector<1x128xf32> to vector<64x128xf32>
    %21 = arith.addf %18, %20 : vector<64x128xf32>
    %22 = math.tanh %21 : vector<64x128xf32>
    %c0_20 = arith.constant 0 : index
    %c0_21 = arith.constant 0 : index
    %23 = vector.load %arg10[%c0_20, %c0_21] : memref<128x2xf32, #tpu.memory_space<vmem>>, vector<128x2xf32>
    %cst_22 = arith.constant dense<0.000000e+00> : vector<64x2xf32>
    %24 = tpu.matmul %22, %23, %cst_22 {dimension_numbers = #tpu.dot_dimension_numbers<[1], [0], [0], [1], [0, 0, 1, 1], [], []>} : vector<64x128xf32>, vector<128x2xf32>, vector<64x2xf32> -> vector<64x2xf32>
    %c0_23 = arith.constant 0 : index
    %c0_24 = arith.constant 0 : index
    %25 = vector.load %arg2[%c0_23, %c0_24] : memref<64x64xf32, #tpu.memory_space<vmem>>, vector<64x64xf32>
    %cst_25 = arith.constant dense<0.000000e+00> : vector<64x2xf32>
    %26 = tpu.matmul %25, %24, %cst_25 {dimension_numbers = #tpu.dot_dimension_numbers<[1], [0], [0], [1], [0, 0, 1, 1], [], []>} : vector<64x64xf32>, vector<64x2xf32>, vector<64x2xf32> -> vector<64x2xf32>
    %27 = vector.extract_strided_slice %26 {offsets = [0, 0], sizes = [64, 1], strides = [1, 1]} : vector<64x2xf32> to vector<64x1xf32>
    %28 = vector.extract_strided_slice %24 {offsets = [0, 1], sizes = [64, 1], strides = [1, 1]} : vector<64x2xf32> to vector<64x1xf32>
    %29 = arith.addf %27, %28 : vector<64x1xf32>
    %c0_26 = arith.constant 0 : index
    %c0_27 = arith.constant 0 : index
    %30 = vector.load %arg11[%c0_26, %c0_27] : memref<1x1xf32, #tpu.memory_space<vmem>>, vector<1x1xf32>
    %31 = vector.broadcast %30 : vector<1x1xf32> to vector<64x1xf32>
    %32 = arith.addf %29, %31 : vector<64x1xf32>
    %33 = math.tanh %32 : vector<64x1xf32>
    %34 = tpu.iota {dimensions = array<i32: 1>} : vector<64x128xi32>
    %c32_i32 = arith.constant 32 : i32
    %35 = vector.broadcast %c32_i32 : i32 to vector<64x128xi32>
    %36 = arith.cmpi eq, %34, %35 : vector<64x128xi32>
    %cst_28 = arith.constant 0.000000e+00 : f32
    %37 = vector.shape_cast %33 : vector<64x1xf32> to vector<64x1xf32>
    %38 = vector.broadcast %37 : vector<64x1xf32> to vector<64x128xf32>
    %39 = vector.broadcast %cst_28 : f32 to vector<64x128xf32>
    %40 = arith.select %36, %38, %39 : vector<64x128xi1>, vector<64x128xf32>
    %41 = arith.addf %22, %40 : vector<64x128xf32>
    %c0_29 = arith.constant 0 : index
    %c0_30 = arith.constant 0 : index
    %42 = vector.load %arg12[%c0_29, %c0_30] : memref<64x128xf32, #tpu.memory_space<vmem>>, vector<64x128xf32>
    tpu.vector_store %arg12[%c0_29, %c0_30], %41 {strides = array<i32>} : memref<64x128xf32, #tpu.memory_space<vmem>>, vector<64x128xf32>,
    return
  }
  func.func @transform_0(%arg0: i32) -> (i32, i32) {
    %c0_i32 = arith.constant 0 : i32
    %c0_i32_0 = arith.constant 0 : i32
    %c0_i32_1 = arith.constant 0 : i32
    return %c0_i32, %c0_i32_0 : i32, i32
  }
  func.func @transform_1(%arg0: i32) -> (i32, i32) {
    %c0_i32 = arith.constant 0 : i32
    %c0_i32_0 = arith.constant 0 : i32
    %c0_i32_1 = arith.constant 0 : i32
    return %c0_i32, %c0_i32_0 : i32, i32
  }
  func.func @transform_2(%arg0: i32) -> (i32, i32) {
    %c0_i32 = arith.constant 0 : i32
    %c0_i32_0 = arith.constant 0 : i32
    %c0_i32_1 = arith.constant 0 : i32
    return %c0_i32, %c0_i32_0 : i32, i32
  }
  func.func @transform_3(%arg0: i32) -> (i32, i32) {
    %c0_i32 = arith.constant 0 : i32
    %c0_i32_0 = arith.constant 0 : i32
    %c0_i32_1 = arith.constant 0 : i32
    return %c0_i32, %c0_i32_0 : i32, i32
  }
  func.func @transform_4(%arg0: i32) -> (i32, i32) {
    %c0_i32 = arith.constant 0 : i32
    %c0_i32_0 = arith.constant 0 : i32
    %c0_i32_1 = arith.constant 0 : i32
    return %c0_i32, %c0_i32_0 : i32, i32
  }
  func.func @transform_5(%arg0: i32) -> (i32, i32) {
    %c0_i32 = arith.constant 0 : i32
    %c0_i32_0 = arith.constant 0 : i32
    %c0_i32_1 = arith.constant 0 : i32
    return %c0_i32, %c0_i32_0 : i32, i32
  }
  func.func @transform_6(%arg0: i32) -> (i32, i32) {
    %c0_i32 = arith.constant 0 : i32
    %c0_i32_0 = arith.constant 0 : i32
    %c0_i32_1 = arith.constant 0 : i32
    return %c0_i32, %c0_i32_0 : i32, i32
  }
  func.func @transform_7(%arg0: i32) -> (i32, i32) {
    %c0_i32 = arith.constant 0 : i32
    %c0_i32_0 = arith.constant 0 : i32
    %c0_i32_1 = arith.constant 0 : i32
    return %c0_i32, %c0_i32_0 : i32, i32
  }
  func.func @transform_8(%arg0: i32) -> (i32, i32) {
    %c0_i32 = arith.constant 0 : i32
    %c0_i32_0 = arith.constant 0 : i32
    %c0_i32_1 = arith.constant 0 : i32
    return %c0_i32, %c0_i32_0 : i32, i32
  }
  func.func @transform_9(%arg0: i32) -> (i32, i32) {
    %c0_i32 = arith.constant 0 : i32
    %c0_i32_0 = arith.constant 0 : i32
    %c0_i32_1 = arith.constant 0 : i32
    return %c0_i32, %c0_i32_0 : i32, i32
  }
  func.func @transform_10(%arg0: i32) -> (i32, i32) {
    %c0_i32 = arith.constant 0 : i32
    %c0_i32_0 = arith.constant 0 : i32
    %c0_i32_1 = arith.constant 0 : i32
    return %c0_i32, %c0_i32_0 : i32, i32
  }
  func.func @transform_11(%arg0: i32) -> (i32, i32) {
    %c0_i32 = arith.constant 0 : i32
    %c0_i32_0 = arith.constant 0 : i32
    %c0_i32_1 = arith.constant 0 : i32
    return %c0_i32, %c0_i32_0 : i32, i32
  }
}

module attributes {stable_mosaic.version = 11 : i64} {
  func.func @_gcn_block2_kernel(%arg0: i32, %arg1: memref<8x8xf32, #tpu.memory_space<vmem>>, %arg2: memref<8x8xf32, #tpu.memory_space<vmem>>, %arg3: memref<8x128xf32, #tpu.memory_space<vmem>>, %arg4: memref<128x128xf32, #tpu.memory_space<vmem>>, %arg5: memref<1x128xf32, #tpu.memory_space<vmem>>, %arg6: memref<128x128xf32, #tpu.memory_space<vmem>>, %arg7: memref<1x128xf32, #tpu.memory_space<vmem>>, %arg8: memref<128x2xf32, #tpu.memory_space<vmem>>, %arg9: memref<1x1xf32, #tpu.memory_space<vmem>>, %arg10: memref<8x128xf32, #tpu.memory_space<vmem>>) attributes {dimension_semantics = [#tpu.dimension_semantics<arbitrary>], iteration_bounds = array<i64: 1>, scalar_prefetch = 0 : i64, scratch_operands = 0 : i64, tpu.core_type = #tpu.core_type<tc>, window_params = [{pipeline_mode = #tpu.pipeline_mode<synchronous>, transform_indices = @transform_0, window_bounds = array<i64: 8, 8>}, {pipeline_mode = #tpu.pipeline_mode<synchronous>, transform_indices = @transform_1, window_bounds = array<i64: 8, 8>}, {pipeline_mode = #tpu.pipeline_mode<synchronous>, transform_indices = @transform_2, window_bounds = array<i64: 8, 128>}, {pipeline_mode = #tpu.pipeline_mode<synchronous>, transform_indices = @transform_3, window_bounds = array<i64: 128, 128>}, {pipeline_mode = #tpu.pipeline_mode<synchronous>, transform_indices = @transform_4, window_bounds = array<i64: 1, 128>}, {pipeline_mode = #tpu.pipeline_mode<synchronous>, transform_indices = @transform_5, window_bounds = array<i64: 128, 128>}, {pipeline_mode = #tpu.pipeline_mode<synchronous>, transform_indices = @transform_6, window_bounds = array<i64: 1, 128>}, {pipeline_mode = #tpu.pipeline_mode<synchronous>, transform_indices = @transform_7, window_bounds = array<i64: 128, 2>}, {pipeline_mode = #tpu.pipeline_mode<synchronous>, transform_indices = @transform_8, window_bounds = array<i64: 1, 1>}, {pipeline_mode = #tpu.pipeline_mode<synchronous>, transform_indices = @transform_9, window_bounds = array<i64: 8, 128>}]} {
    %c0 = arith.constant 0 : index
    %c0_0 = arith.constant 0 : index
    %0 = vector.load %arg1[%c0, %c0_0] : memref<8x8xf32, #tpu.memory_space<vmem>>, vector<8x8xf32>
    %c0_1 = arith.constant 0 : index
    %c0_2 = arith.constant 0 : index
    %1 = vector.load %arg3[%c0_1, %c0_2] : memref<8x128xf32, #tpu.memory_space<vmem>>, vector<8x128xf32>
    %c0_3 = arith.constant 0 : index
    %c0_4 = arith.constant 0 : index
    %2 = vector.load %arg4[%c0_3, %c0_4] : memref<128x128xf32, #tpu.memory_space<vmem>>, vector<128x128xf32>
    %cst = arith.constant dense<0.000000e+00> : vector<8x128xf32>
    %3 = tpu.matmul %1, %2, %cst {dimension_numbers = #tpu.dot_dimension_numbers<[1], [0], [0], [1], [0, 0, 1, 1], [], []>} : vector<8x128xf32>, vector<128x128xf32>, vector<8x128xf32> -> vector<8x128xf32>
    %cst_5 = arith.constant dense<0.000000e+00> : vector<8x128xf32>
    %4 = tpu.matmul %0, %3, %cst_5 {dimension_numbers = #tpu.dot_dimension_numbers<[1], [0], [0], [1], [0, 0, 1, 1], [], []>} : vector<8x8xf32>, vector<8x128xf32>, vector<8x128xf32> -> vector<8x128xf32>
    %c0_6 = arith.constant 0 : index
    %c0_7 = arith.constant 0 : index
    %5 = vector.load %arg5[%c0_6, %c0_7] : memref<1x128xf32, #tpu.memory_space<vmem>>, vector<1x128xf32>
    %6 = vector.broadcast %5 : vector<1x128xf32> to vector<8x128xf32>
    %7 = arith.addf %4, %6 : vector<8x128xf32>
    %8 = math.tanh %7 : vector<8x128xf32>
    %c0_8 = arith.constant 0 : index
    %c0_9 = arith.constant 0 : index
    %9 = vector.load %arg6[%c0_8, %c0_9] : memref<128x128xf32, #tpu.memory_space<vmem>>, vector<128x128xf32>
    %cst_10 = arith.constant dense<0.000000e+00> : vector<8x128xf32>
    %10 = tpu.matmul %8, %9, %cst_10 {dimension_numbers = #tpu.dot_dimension_numbers<[1], [0], [0], [1], [0, 0, 1, 1], [], []>} : vector<8x128xf32>, vector<128x128xf32>, vector<8x128xf32> -> vector<8x128xf32>
    %cst_11 = arith.constant dense<0.000000e+00> : vector<8x128xf32>
    %11 = tpu.matmul %0, %10, %cst_11 {dimension_numbers = #tpu.dot_dimension_numbers<[1], [0], [0], [1], [0, 0, 1, 1], [], []>} : vector<8x8xf32>, vector<8x128xf32>, vector<8x128xf32> -> vector<8x128xf32>
    %c0_12 = arith.constant 0 : index
    %c0_13 = arith.constant 0 : index
    %12 = vector.load %arg7[%c0_12, %c0_13] : memref<1x128xf32, #tpu.memory_space<vmem>>, vector<1x128xf32>
    %13 = vector.broadcast %12 : vector<1x128xf32> to vector<8x128xf32>
    %14 = arith.addf %11, %13 : vector<8x128xf32>
    %c0_14 = arith.constant 0 : index
    %c0_15 = arith.constant 0 : index
    %15 = vector.load %arg8[%c0_14, %c0_15] : memref<128x2xf32, #tpu.memory_space<vmem>>, vector<128x2xf32>
    %cst_16 = arith.constant dense<0.000000e+00> : vector<8x2xf32>
    %16 = tpu.matmul %14, %15, %cst_16 {dimension_numbers = #tpu.dot_dimension_numbers<[1], [0], [0], [1], [0, 0, 1, 1], [], []>} : vector<8x128xf32>, vector<128x2xf32>, vector<8x2xf32> -> vector<8x2xf32>
    %c0_17 = arith.constant 0 : index
    %c0_18 = arith.constant 0 : index
    %17 = vector.load %arg2[%c0_17, %c0_18] : memref<8x8xf32, #tpu.memory_space<vmem>>, vector<8x8xf32>
    %cst_19 = arith.constant dense<0.000000e+00> : vector<8x2xf32>
    %18 = tpu.matmul %17, %16, %cst_19 {dimension_numbers = #tpu.dot_dimension_numbers<[1], [0], [0], [1], [0, 0, 1, 1], [], []>} : vector<8x8xf32>, vector<8x2xf32>, vector<8x2xf32> -> vector<8x2xf32>
    %19 = vector.extract_strided_slice %18 {offsets = [0, 0], sizes = [8, 1], strides = [1, 1]} : vector<8x2xf32> to vector<8x1xf32>
    %20 = vector.extract_strided_slice %16 {offsets = [0, 1], sizes = [8, 1], strides = [1, 1]} : vector<8x2xf32> to vector<8x1xf32>
    %21 = arith.addf %19, %20 : vector<8x1xf32>
    %c0_20 = arith.constant 0 : index
    %c0_21 = arith.constant 0 : index
    %22 = vector.load %arg9[%c0_20, %c0_21] : memref<1x1xf32, #tpu.memory_space<vmem>>, vector<1x1xf32>
    %23 = vector.broadcast %22 : vector<1x1xf32> to vector<8x1xf32>
    %24 = arith.addf %21, %23 : vector<8x1xf32>
    %25 = math.tanh %24 : vector<8x1xf32>
    %26 = tpu.iota {dimensions = array<i32: 1>} : vector<8x128xi32>
    %c64_i32 = arith.constant 64 : i32
    %27 = vector.broadcast %c64_i32 : i32 to vector<8x128xi32>
    %28 = arith.cmpi eq, %26, %27 : vector<8x128xi32>
    %cst_22 = arith.constant 0.000000e+00 : f32
    %29 = vector.shape_cast %25 : vector<8x1xf32> to vector<8x1xf32>
    %30 = vector.broadcast %29 : vector<8x1xf32> to vector<8x128xf32>
    %31 = vector.broadcast %cst_22 : f32 to vector<8x128xf32>
    %32 = arith.select %28, %30, %31 : vector<8x128xi1>, vector<8x128xf32>
    %33 = arith.addf %14, %32 : vector<8x128xf32>
    %c0_23 = arith.constant 0 : index
    %c0_24 = arith.constant 0 : index
    %34 = vector.load %arg10[%c0_23, %c0_24] : memref<8x128xf32, #tpu.memory_space<vmem>>, vector<8x128xf32>
    tpu.vector_store %arg10[%c0_23, %c0_24], %33 {strides = array<i32>} : memref<8x128xf32, #tpu.memory_space<vmem>>, vector<8x128xf32>,
    return
  }
  func.func @transform_0(%arg0: i32) -> (i32, i32) {
    %c0_i32 = arith.constant 0 : i32
    %c0_i32_0 = arith.constant 0 : i32
    %c0_i32_1 = arith.constant 0 : i32
    return %c0_i32, %c0_i32_0 : i32, i32
  }
  func.func @transform_1(%arg0: i32) -> (i32, i32) {
    %c0_i32 = arith.constant 0 : i32
    %c0_i32_0 = arith.constant 0 : i32
    %c0_i32_1 = arith.constant 0 : i32
    return %c0_i32, %c0_i32_0 : i32, i32
  }
  func.func @transform_2(%arg0: i32) -> (i32, i32) {
    %c0_i32 = arith.constant 0 : i32
    %c0_i32_0 = arith.constant 0 : i32
    %c0_i32_1 = arith.constant 0 : i32
    return %c0_i32, %c0_i32_0 : i32, i32
  }
  func.func @transform_3(%arg0: i32) -> (i32, i32) {
    %c0_i32 = arith.constant 0 : i32
    %c0_i32_0 = arith.constant 0 : i32
    %c0_i32_1 = arith.constant 0 : i32
    return %c0_i32, %c0_i32_0 : i32, i32
  }
  func.func @transform_4(%arg0: i32) -> (i32, i32) {
    %c0_i32 = arith.constant 0 : i32
    %c0_i32_0 = arith.constant 0 : i32
    %c0_i32_1 = arith.constant 0 : i32
    return %c0_i32, %c0_i32_0 : i32, i32
  }
  func.func @transform_5(%arg0: i32) -> (i32, i32) {
    %c0_i32 = arith.constant 0 : i32
    %c0_i32_0 = arith.constant 0 : i32
    %c0_i32_1 = arith.constant 0 : i32
    return %c0_i32, %c0_i32_0 : i32, i32
  }
  func.func @transform_6(%arg0: i32) -> (i32, i32) {
    %c0_i32 = arith.constant 0 : i32
    %c0_i32_0 = arith.constant 0 : i32
    %c0_i32_1 = arith.constant 0 : i32
    return %c0_i32, %c0_i32_0 : i32, i32
  }
  func.func @transform_7(%arg0: i32) -> (i32, i32) {
    %c0_i32 = arith.constant 0 : i32
    %c0_i32_0 = arith.constant 0 : i32
    %c0_i32_1 = arith.constant 0 : i32
    return %c0_i32, %c0_i32_0 : i32, i32
  }
  func.func @transform_8(%arg0: i32) -> (i32, i32) {
    %c0_i32 = arith.constant 0 : i32
    %c0_i32_0 = arith.constant 0 : i32
    %c0_i32_1 = arith.constant 0 : i32
    return %c0_i32, %c0_i32_0 : i32, i32
  }
  func.func @transform_9(%arg0: i32) -> (i32, i32) {
    %c0_i32 = arith.constant 0 : i32
    %c0_i32_0 = arith.constant 0 : i32
    %c0_i32_1 = arith.constant 0 : i32
    return %c0_i32, %c0_i32_0 : i32, i32
  }
}

</mosaic_0001>

<bundles_post_ra>
// kernel: squeeze.9
= control target key start
LH: loop header
LB: loop body
LE: loop exit
PB: predicated region body
PF: predicated region fallthrough
CT: control target
= control target key end

     0   :  { %s37_s8 = smov 80   ;;  %vm7_vm0 = vcmask 130048   ;;  %s38_s9 = smov 96   ;;  %s55_s0 = inlined_call_operand.vmem [shape: f32[64], index: 0, kind: input, shape index: {}]   ;;  %s56_s1 = inlined_call_operand.vmem [shape: f32[4,16], index: 1, kind: output, shape index: {}]  }
   0x1   :  { %v4_v0 = vld [vmem:[%s55_s0] sm:$0x1]  ;;  %s36_s0 = smov 112  }
   0x2   :  { %5 = vst [vmem:[#allocation1] sm:$0x1] %v4_v0 }
   0x9   :  { %v9_v1 = vld [vmem:[#allocation1] sm:$0x1]  }
   0xa   :  { %v21_v2 = vld [vmem:[#allocation1] sm:$0x1]   ;;  %10 = vrot.lane.b32.xlu0 %v9_v1, %s36_s0 }
   0xb   :  { %22 = vrot.lane.b32.xlu1 %v21_v2, %s37_s8  ;;  %v6_v3 = vld [vmem:[#allocation1] sm:$0x1]  }
   0xc   :  { %v15_v4 = vld [vmem:[#allocation1] sm:$0x1]   ;;  %8 = vst.msk [vmem:[#allocation0] sm:$0x1] %vm7_vm0, %v6_v3  }
   0xe   :  { %16 = vrot.lane.b32.xlu0 %v15_v4, %s38_s9 }
  0x7c   :  { %v11_v5 = vpop.permute.xlu0 %10  }
  0x7d   :  { %v23_v6 = vpop.permute.xlu1 %22   ;;  %14 = vst.msk [vmem:[#allocation0 + $0x1] sm:$0x1] %vm7_vm0, %v11_v5  }
  0x7e   :  { %26 = vst.msk [vmem:[#allocation0 + $0x3] sm:$0x1] %vm7_vm0, %v23_v6  }
  0x80   :  { %v17_v7 = vpop.permute.xlu0 %16  }
  0x81   :  { %20 = vst.msk [vmem:[#allocation0 + $0x2] sm:$0x1] %vm7_vm0, %v17_v7  }
  0x88   :  { %v30_v8 = vld [vmem:[#allocation0] sm:$0xf] }
  0x89   :  { %32 = vst [vmem:[%s56_s1] sm:$0xf] %v30_v8 }

// kernel: squeeze.11
= control target key start
LH: loop header
LB: loop body
LE: loop exit
PB: predicated region body
PF: predicated region fallthrough
CT: control target
= control target key end

     0   :  { %s37_s8 = smov 122   ;;  %vm7_vm0 = vcmask 15360   ;;  %s38_s9 = smov 124   ;;  %s55_s0 = inlined_call_operand.vmem [shape: f32[8], index: 0, kind: input, shape index: {}]   ;;  %s56_s1 = inlined_call_operand.vmem [shape: f32[4,2], index: 1, kind: output, shape index: {}]  }
   0x1   :  { %v4_v0 = vld [vmem:[%s55_s0] sm:$0x1]  ;;  %s36_s0 = smov 126  }
   0x2   :  { %5 = vst [vmem:[#allocation1] sm:$0x1] %v4_v0 }
   0x9   :  { %v9_v1 = vld [vmem:[#allocation1] sm:$0x1]  }
   0xa   :  { %v21_v2 = vld [vmem:[#allocation1] sm:$0x1]   ;;  %10 = vrot.lane.b32.xlu0 %v9_v1, %s36_s0 }
   0xb   :  { %22 = vrot.lane.b32.xlu1 %v21_v2, %s37_s8  ;;  %v6_v3 = vld [vmem:[#allocation1] sm:$0x1]  }
   0xc   :  { %v15_v4 = vld [vmem:[#allocation1] sm:$0x1]   ;;  %8 = vst.msk [vmem:[#allocation0] sm:$0x1] %vm7_vm0, %v6_v3  }
   0xe   :  { %16 = vrot.lane.b32.xlu0 %v15_v4, %s38_s9 }
  0x7c   :  { %v11_v5 = vpop.permute.xlu0 %10  }
  0x7d   :  { %v23_v6 = vpop.permute.xlu1 %22   ;;  %14 = vst.msk [vmem:[#allocation0 + $0x1] sm:$0x1] %vm7_vm0, %v11_v5  }
  0x7e   :  { %26 = vst.msk [vmem:[#allocation0 + $0x3] sm:$0x1] %vm7_vm0, %v23_v6  }
  0x80   :  { %v17_v7 = vpop.permute.xlu0 %16  }
  0x81   :  { %20 = vst.msk [vmem:[#allocation0 + $0x2] sm:$0x1] %vm7_vm0, %v17_v7  }
  0x88   :  { %v30_v8 = vld [vmem:[#allocation0] sm:$0xf] }
  0x89   :  { %32 = vst [vmem:[%s56_s1] sm:$0xf] %v30_v8 }

// kernel: custom-call
= control target key start
LH: loop header
LB: loop body
LE: loop exit
PB: predicated region body
PF: predicated region fallthrough
CT: control target
= control target key end

     0   :  { %5 = vsyncpa [#allocation9], 0  ;;  %s1218_s0 = inlined_call_operand.vmem [shape: f32[4,2], index: 0, kind: input, shape index: {}]   ;;  %s1219_s1 = inlined_call_operand.hbm [shape: f32[4,1], index: 1, kind: output, shape index: {0}]   ;;  %s1220_s2 = inlined_call_operand.vmem [shape: s32[4,1], index: 2, kind: output, shape index: {1}]  }
   0x1   :  { %v28_v0 = vld [vmem:[%s1218_s0] sm:$0xf]  ;;  %v46_v1 = vlaneseq  ;;  %v1085_v15 = vmov 2147483648   ;;  %v1086_v16 = vmov 2147483647  }
   0x2   :  { %29 = vst [vmem:[#allocation16] sm:$0xf] %v28_v0  ;;  %75 = vst [vmem:[#allocation13] sm:$0xff] %v1085_v15 }
   0x3   :  { %v1110_v2 = vshrl.u32 %v46_v1, 7  ;;  %v47_v3 = vand.u32 127, %v46_v1  ;;  %76 = vst [vmem:[#allocation15] sm:$0xff] %v1086_v16 }
   0x5   :  { %v50_v4 = vshrl.u32 %v1110_v2, 2 }
   0x7   :  { %v52_v5 = vmul.u32 128, %v50_v4 }
   0x9   :  { %v53_v6 = vadd.s32 %v52_v5, %v47_v3  ;;  %v55_v7 = vld [vmem:[#allocation16] sm:$0xff] }
   0xa   :  { %vm56_vm0 = vcmp.lt.s32.totalorder %v55_v7, 0  ;;  %v57_v8 = vsub.s32 2147483647, %v55_v7 }
   0xb   :  { %vm60_vm1 = vcmp.lt.s32.totalorder %v53_v6, 2  ;;  %v88_v9 = vrot.slane %v53_v6, 4 }
   0xc   :  { %v58_v10 = vsel %vm56_vm0, %v57_v8, %v55_v7 }
   0xd   :  { %v61_v11 = vsel %vm60_vm1, %v58_v10, 2147483648  ;;  %vm92_vm2 = vcmp.lt.s32.totalorder %v88_v9, %v53_v6 }
   0xe   :  { %62 = vst [vmem:[#allocation16] sm:$0xff] %v61_v11  ;;  %v87_v12 = vrot.slane %v61_v11, 4 }
  0x10   :  { %vm90_vm3 = vcmp.gt.s32.totalorder %v87_v12, %v61_v11  ;;  %vm91_vm4 = vcmp.eq.s32.totalorder %v87_v12, %v61_v11 }
  0x11   :  { %vm93_vm5 = vmand %vm91_vm4, %vm92_vm2 }
  0x12   :  { %vm94_vm6 = vmor %vm90_vm3, %vm93_vm5 }
  0x13   :  { %v96_v13 = vsel %vm94_vm6, %v88_v9, %v53_v6  ;;  %v95_v14 = vsel %vm94_vm6, %v87_v12, %v61_v11 }
  0x14   :  { %130 = vxpose.xlu1.b32.start [1/16] %v96_v13, 128  ;;  %98 = vxpose.xlu0.b32.start [1/16] %v95_v14, 128 }
  0x18   :  { %131 = vxpose.xlu1.b32.cont [2/16] %v96_v13, 128  ;;  %99 = vxpose.xlu0.b32.cont [2/16] %v95_v14, 128 }
  0x1c   :  { %132 = vxpose.xlu1.b32.cont [3/16] %v96_v13, 128  ;;  %100 = vxpose.xlu0.b32.cont [3/16] %v95_v14, 128 }
  0x20   :  { %133 = vxpose.xlu1.b32.cont [4/16] %v96_v13, 128  ;;  %101 = vxpose.xlu0.b32.cont [4/16] %v95_v14, 128 }
  0x24   :  { %134 = vxpose.xlu1.b32.cont [5/16] %v96_v13, 128  ;;  %102 = vxpose.xlu0.b32.cont [5/16] %v95_v14, 128 }
  0x28   :  { %135 = vxpose.xlu1.b32.cont [6/16] %v96_v13, 128  ;;  %103 = vxpose.xlu0.b32.cont [6/16] %v95_v14, 128 }
  0x2c   :  { %136 = vxpose.xlu1.b32.cont [7/16] %v96_v13, 128  ;;  %104 = vxpose.xlu0.b32.cont [7/16] %v95_v14, 128 }
  0x30   :  { %137 = vxpose.xlu1.b32.cont [8/16] %v96_v13, 128  ;;  %105 = vxpose.xlu0.b32.cont [8/16] %v95_v14, 128 }
  0x34   :  { %138 = vxpose.xlu1.b32.cont [9/16] %v96_v13, 128  ;;  %106 = vxpose.xlu0.b32.cont [9/16] %v95_v14, 128 }
  0x38   :  { %139 = vxpose.xlu1.b32.cont [10/16] %v96_v13, 128  ;;  %107 = vxpose.xlu0.b32.cont [10/16] %v95_v14, 128 }
  0x3c   :  { %140 = vxpose.xlu1.b32.cont [11/16] %v96_v13, 128  ;;  %108 = vxpose.xlu0.b32.cont [11/16] %v95_v14, 128 }
  0x40   :  { %141 = vxpose.xlu1.b32.cont [12/16] %v96_v13, 128  ;;  %109 = vxpose.xlu0.b32.cont [12/16] %v95_v14, 128 }
  0x44   :  { %142 = vxpose.xlu1.b32.cont [13/16] %v96_v13, 128  ;;  %110 = vxpose.xlu0.b32.cont [13/16] %v95_v14, 128 }
  0x48   :  { %143 = vxpose.xlu1.b32.cont [14/16] %v96_v13, 128  ;;  %111 = vxpose.xlu0.b32.cont [14/16] %v95_v14, 128 }
  0x4c   :  { %144 = vxpose.xlu1.b32.cont [15/16] %v96_v13, 128  ;;  %112 = vxpose.xlu0.b32.cont [15/16] %v95_v14, 128 }
  0x50   :  { %145 = vxpose.xlu1.b32.end [16/16] %v96_v13, 128  ;;  %113 = vxpose.xlu0.b32.end [16/16] %v95_v14, 128 }
  0x94   :  { %v146_v17 = vpop.trf.xlu1  ;;  %v114_v18 = vpop.trf.xlu0 }
  0x98   :  { %v147_v19 = vpop.trf.xlu1  ;;  %v115_v20 = vpop.trf.xlu0 }
  0x99   :  { %vm166_vm7 = vcmp.lt.s32.totalorder %v147_v19, %v146_v17  ;;  %vm164_vm8 = vcmp.gt.s32.totalorder %v115_v20, %v114_v18  ;;  %vm165_vm9 = vcmp.eq.s32.totalorder %v115_v20, %v114_v18 }
  0x9a   :  { %vm167_vm10 = vmand %vm165_vm9, %vm166_vm7 }
  0x9b   :  { %vm168_vm11 = vmor %vm164_vm8, %vm167_vm10 }
  0x9c   :  { %v169_v21 = vsel %vm168_vm11, %v115_v20, %v114_v18  ;;  %v148_v22 = vpop.trf.xlu1  ;;  %v170_v23 = vsel %vm168_vm11, %v147_v19, %v146_v17  ;;  %v116_v24 = vpop.trf.xlu0 }
  0x9d   :  { %vm175_vm12 = vcmp.lt.s32.totalorder %v148_v22, %v170_v23  ;;  %vm173_vm13 = vcmp.gt.s32.totalorder %v116_v24, %v169_v21  ;;  %vm174_vm14 = vcmp.eq.s32.totalorder %v116_v24, %v169_v21 }
  0x9e   :  { %vm176_vm15 = vmand %vm174_vm14, %vm175_vm12 }
  0x9f   :  { %vm177_vm0 = vmor %vm173_vm13, %vm176_vm15 }
  0xa0   :  { %v178_v25 = vsel %vm177_vm0, %v116_v24, %v169_v21  ;;  %v149_v26 = vpop.trf.xlu1  ;;  %v179_v27 = vsel %vm177_vm0, %v148_v22, %v170_v23  ;;  %v117_v28 = vpop.trf.xlu0 }
  0xa1   :  { %vm184_vm1 = vcmp.lt.s32.totalorder %v149_v26, %v179_v27  ;;  %vm182_vm2 = vcmp.gt.s32.totalorder %v117_v28, %v178_v25  ;;  %vm183_vm3 = vcmp.eq.s32.totalorder %v117_v28, %v178_v25 }
  0xa2   :  { %vm185_vm4 = vmand %vm183_vm3, %vm184_vm1 }
  0xa3   :  { %vm186_vm5 = vmor %vm182_vm2, %vm185_vm4 }
  0xa4   :  { %v187_v29 = vsel %vm186_vm5, %v117_v28, %v178_v25  ;;  %v150_v30 = vpop.trf.xlu1  ;;  %v188_v31 = vsel %vm186_vm5, %v149_v26, %v179_v27  ;;  %v118_v32 = vpop.trf.xlu0 }
  0xa5   :  { %vm193_vm6 = vcmp.lt.s32.totalorder %v150_v30, %v188_v31  ;;  %vm191_vm7 = vcmp.gt.s32.totalorder %v118_v32, %v187_v29  ;;  %vm192_vm8 = vcmp.eq.s32.totalorder %v118_v32, %v187_v29 }
  0xa6   :  { %vm194_vm9 = vmand %vm192_vm8, %vm193_vm6 }
  0xa7   :  { %vm195_vm10 = vmor %vm191_vm7, %vm194_vm9 }
  0xa8   :  { %v196_v33 = vsel %vm195_vm10, %v118_v32, %v187_v29  ;;  %v151_v34 = vpop.trf.xlu1  ;;  %v197_v35 = vsel %vm195_vm10, %v150_v30, %v188_v31  ;;  %v119_v36 = vpop.trf.xlu0 }
  0xa9   :  { %vm202_vm11 = vcmp.lt.s32.totalorder %v151_v34, %v197_v35  ;;  %vm200_vm12 = vcmp.gt.s32.totalorder %v119_v36, %v196_v33  ;;  %vm201_vm13 = vcmp.eq.s32.totalorder %v119_v36, %v196_v33 }
  0xaa   :  { %vm203_vm14 = vmand %vm201_vm13, %vm202_vm11 }
  0xab   :  { %vm204_vm15 = vmor %vm200_vm12, %vm203_vm14 }
  0xac   :  { %v205_v37 = vsel %vm204_vm15, %v119_v36, %v196_v33  ;;  %v152_v38 = vpop.trf.xlu1  ;;  %v206_v39 = vsel %vm204_vm15, %v151_v34, %v197_v35  ;;  %v120_v40 = vpop.trf.xlu0 }
  0xad   :  { %vm211_vm0 = vcmp.lt.s32.totalorder %v152_v38, %v206_v39  ;;  %vm209_vm1 = vcmp.gt.s32.totalorder %v120_v40, %v205_v37  ;;  %vm210_vm2 = vcmp.eq.s32.totalorder %v120_v40, %v205_v37 }
  0xae   :  { %vm212_vm3 = vmand %vm210_vm2, %vm211_vm0 }
  0xaf   :  { %vm213_vm4 = vmor %vm209_vm1, %vm212_vm3 }
  0xb0   :  { %v214_v41 = vsel %vm213_vm4, %v120_v40, %v205_v37  ;;  %v153_v42 = vpop.trf.xlu1  ;;  %v215_v43 = vsel %vm213_vm4, %v152_v38, %v206_v39  ;;  %v121_v44 = vpop.trf.xlu0 }
  0xb1   :  { %vm220_vm5 = vcmp.lt.s32.totalorder %v153_v42, %v215_v43  ;;  %vm218_vm6 = vcmp.gt.s32.totalorder %v121_v44, %v214_v41  ;;  %vm219_vm7 = vcmp.eq.s32.totalorder %v121_v44, %v214_v41 }
  0xb2   :  { %vm221_vm8 = vmand %vm219_vm7, %vm220_vm5 }
  0xb3   :  { %vm222_vm9 = vmor %vm218_vm6, %vm221_vm8 }
  0xb4   :  { %v223_v45 = vsel %vm222_vm9, %v121_v44, %v214_v41  ;;  %v154_v46 = vpop.trf.xlu1  ;;  %v224_v47 = vsel %vm222_vm9, %v153_v42, %v215_v43  ;;  %v122_v48 = vpop.trf.xlu0 }
  0xb5   :  { %vm229_vm10 = vcmp.lt.s32.totalorder %v154_v46, %v224_v47  ;;  %vm227_vm11 = vcmp.gt.s32.totalorder %v122_v48, %v223_v45  ;;  %vm228_vm12 = vcmp.eq.s32.totalorder %v122_v48, %v223_v45 }
  0xb6   :  { %vm230_vm13 = vmand %vm228_vm12, %vm229_vm10 }
  0xb7   :  { %vm231_vm14 = vmor %vm227_vm11, %vm230_vm13 }
  0xb8   :  { %v232_v49 = vsel %vm231_vm14, %v122_v48, %v223_v45  ;;  %v155_v50 = vpop.trf.xlu1  ;;  %v233_v51 = vsel %vm231_vm14, %v154_v46, %v224_v47  ;;  %v123_v52 = vpop.trf.xlu0  ;;  %v1087_v46 = vmov 839939668  }
  0xb9   :  { %vm238_vm15 = vcmp.lt.s32.totalorder %v155_v50, %v233_v51  ;;  %vm236_vm0 = vcmp.gt.s32.totalorder %v123_v52, %v232_v49  ;;  %vm237_vm1 = vcmp.eq.s32.totalorder %v123_v52, %v232_v49  ;;  %v546_v47 = vunpack.c.l.s4 %v1087_v46 }
  0xba   :  { %vm239_vm2 = vmand %vm237_vm1, %vm238_vm15 }
  0xbb   :  { %vm240_vm3 = vmor %vm236_vm0, %vm239_vm2  ;;  %v547_v48 = vunpack.c.0.s8 %v546_v47 }
  0xbc   :  { %v241_v53 = vsel %vm240_vm3, %v123_v52, %v232_v49  ;;  %v156_v54 = vpop.trf.xlu1  ;;  %v242_v55 = vsel %vm240_vm3, %v155_v50, %v233_v51  ;;  %v124_v56 = vpop.trf.xlu0  ;;  %v1088_v49 = vmov 1417023538  }
  0xbd   :  { %vm247_vm4 = vcmp.lt.s32.totalorder %v156_v54, %v242_v55  ;;  %vm245_vm5 = vcmp.gt.s32.totalorder %v124_v56, %v241_v53  ;;  %vm246_vm6 = vcmp.eq.s32.totalorder %v124_v56, %v241_v53  ;;  %v574_v50 = vunpack.c.l.s4 %v1088_v49 }
  0xbe   :  { %vm248_vm7 = vmand %vm246_vm6, %vm247_vm4 }
  0xbf   :  { %vm249_vm8 = vmor %vm245_vm5, %vm248_vm7 }
  0xc0   :  { %v250_v57 = vsel %vm249_vm8, %v124_v56, %v241_v53  ;;  %v157_v58 = vpop.trf.xlu1  ;;  %v251_v59 = vsel %vm249_vm8, %v156_v54, %v242_v55  ;;  %v125_v60 = vpop.trf.xlu0  ;;  %v1116_v53 = vsub.s32 %v547_v48, %v1110_v2  ;;  %v567_v54 = vand.u32 4, %v1110_v2 }
  0xc1   :  { %vm256_vm9 = vcmp.lt.s32.totalorder %v157_v58, %v251_v59  ;;  %vm254_vm10 = vcmp.gt.s32.totalorder %v125_v60, %v250_v57  ;;  %vm255_vm11 = vcmp.eq.s32.totalorder %v125_v60, %v250_v57  ;;  %v575_v55 = vunpack.c.0.s8 %v574_v50 }
  0xc2   :  { %vm257_vm12 = vmand %vm255_vm11, %vm256_vm9 }
  0xc3   :  { %vm258_vm13 = vmor %vm254_vm10, %vm257_vm12 }
  0xc4   :  { %v259_v61 = vsel %vm258_vm13, %v125_v60, %v250_v57  ;;  %v158_v62 = vpop.trf.xlu1  ;;  %v260_v63 = vsel %vm258_vm13, %v157_v58, %v251_v59  ;;  %v126_v0 = vpop.trf.xlu0 }
  0xc5   :  { %vm265_vm14 = vcmp.lt.s32.totalorder %v158_v62, %v260_v63  ;;  %vm263_vm15 = vcmp.gt.s32.totalorder %v126_v0, %v259_v61  ;;  %vm264_vm0 = vcmp.eq.s32.totalorder %v126_v0, %v259_v61 }
  0xc6   :  { %vm266_vm1 = vmand %vm264_vm0, %vm265_vm14 }
  0xc7   :  { %vm267_vm2 = vmor %vm263_vm15, %vm266_vm1 }
  0xc8   :  { %v268_v3 = vsel %vm267_vm2, %v126_v0, %v259_v61  ;;  %v159_v4 = vpop.trf.xlu1  ;;  %v269_v5 = vsel %vm267_vm2, %v158_v62, %v260_v63  ;;  %v127_v6 = vpop.trf.xlu0 }
  0xc9   :  { %vm274_vm3 = vcmp.lt.s32.totalorder %v159_v4, %v269_v5  ;;  %vm272_vm4 = vcmp.gt.s32.totalorder %v127_v6, %v268_v3  ;;  %vm273_vm5 = vcmp.eq.s32.totalorder %v127_v6, %v268_v3 }
  0xca   :  { %vm275_vm6 = vmand %vm273_vm5, %vm274_vm3 }
  0xcb   :  { %vm276_vm7 = vmor %vm272_vm4, %vm275_vm6 }
  0xcc   :  { %v277_v7 = vsel %vm276_vm7, %v127_v6, %v268_v3  ;;  %v160_v8 = vpop.trf.xlu1  ;;  %v278_v9 = vsel %vm276_vm7, %v159_v4, %v269_v5  ;;  %v128_v10 = vpop.trf.xlu0  ;;  %v1089_v3 = vmov 1732584193   ;;  %v1128_v5 = vsub.s32 %v575_v55, %v1110_v2 }
  0xcd   :  { %vm283_vm8 = vcmp.lt.s32.totalorder %v160_v8, %v278_v9  ;;  %vm281_vm9 = vcmp.gt.s32.totalorder %v128_v10, %v277_v7  ;;  %vm282_vm10 = vcmp.eq.s32.totalorder %v128_v10, %v277_v7  ;;  %v602_v4 = vunpack.c.l.s4 %v1089_v3 }
  0xce   :  { %vm284_vm11 = vmand %vm282_vm10, %vm283_vm8  ;;  %v595_v6 = vand.u32 2, %v1110_v2 }
  0xcf   :  { %vm285_vm12 = vmor %vm281_vm9, %vm284_vm11 }
  0xd0   :  { %v286_v11 = vsel %vm285_vm12, %v128_v10, %v277_v7  ;;  %v161_v12 = vpop.trf.xlu1  ;;  %v287_v13 = vsel %vm285_vm12, %v160_v8, %v278_v9  ;;  %v129_v14 = vpop.trf.xlu0  ;;  %v603_v7 = vunpack.c.0.s8 %v602_v4 }
  0xd1   :  { %vm292_vm13 = vcmp.lt.s32.totalorder %v161_v12, %v287_v13  ;;  %vm290_vm14 = vcmp.gt.s32.totalorder %v129_v14, %v286_v11  ;;  %vm291_vm15 = vcmp.eq.s32.totalorder %v129_v14, %v286_v11 }
  0xd2   :  { %vm293_vm0 = vmand %vm291_vm15, %vm292_vm13 }
  0xd3   :  { %vm294_vm1 = vmor %vm290_vm14, %vm293_vm0 }
  0xd4   :  { %v295_v16 = vsel %vm294_vm1, %v129_v14, %v286_v11  ;;  %v296_v17 = vsel %vm294_vm1, %v161_v12, %v287_v13  ;;  %v1142_v14 = vsub.s32 %v603_v7, %v1110_v2 }
  0xd5   :  { %v298_v18 = vrot.slane %v295_v16, 1  ;;  %v299_v19 = vrot.slane %v296_v17, 1 }
  0xd7   :  { %vm301_vm2 = vcmp.gt.s32.totalorder %v298_v18, %v295_v16  ;;  %vm302_vm3 = vcmp.eq.s32.totalorder %v298_v18, %v295_v16  ;;  %vm303_vm4 = vcmp.lt.s32.totalorder %v299_v19, %v296_v17 }
  0xd8   :  { %vm304_vm5 = vmand %vm302_vm3, %vm303_vm4 }
  0xd9   :  { %vm305_vm6 = vmor %vm301_vm2, %vm304_vm5 }
  0xda   :  { %v306_v20 = vsel %vm305_vm6, %v298_v18, %v295_v16  ;;  %v307_v21 = vsel %vm305_vm6, %v299_v19, %v296_v17  ;;  %v623_v19 = vand.u32 1, %v1110_v2 }
  0xdb   :  { %v309_v22 = vrot.slane %v306_v20, 1  ;;  %v310_v23 = vrot.slane %v307_v21, 1 }
  0xdd   :  { %vm312_vm7 = vcmp.gt.s32.totalorder %v309_v22, %v306_v20  ;;  %vm313_vm8 = vcmp.eq.s32.totalorder %v309_v22, %v306_v20  ;;  %vm314_vm9 = vcmp.lt.s32.totalorder %v310_v23, %v307_v21 }
  0xde   :  { %vm315_vm10 = vmand %vm313_vm8, %vm314_vm9 }
  0xdf   :  { %vm316_vm11 = vmor %vm312_vm7, %vm315_vm10 }
  0xe0   :  { %v317_v24 = vsel %vm316_vm11, %v309_v22, %v306_v20  ;;  %v318_v25 = vsel %vm316_vm11, %v310_v23, %v307_v21 }
  0xe1   :  { %v320_v26 = vrot.slane %v317_v24, 1  ;;  %v321_v27 = vrot.slane %v318_v25, 1 }
  0xe3   :  { %vm325_vm12 = vcmp.lt.s32.totalorder %v321_v27, %v318_v25  ;;  %vm323_vm13 = vcmp.gt.s32.totalorder %v320_v26, %v317_v24  ;;  %vm324_vm14 = vcmp.eq.s32.totalorder %v320_v26, %v317_v24 }
  0xe4   :  { %vm326_vm15 = vmand %vm324_vm14, %vm325_vm12 }
  0xe5   :  { %vm327_vm0 = vmor %vm323_vm13, %vm326_vm15 }
  0xe6   :  { %v328_v28 = vsel %vm327_vm0, %v320_v26, %v317_v24  ;;  %v329_v29 = vsel %vm327_vm0, %v321_v27, %v318_v25 }
  0xe7   :  { %v331_v30 = vrot.slane %v328_v28, 1  ;;  %v332_v31 = vrot.slane %v329_v29, 1 }
  0xe9   :  { %vm334_vm1 = vcmp.gt.s32.totalorder %v331_v30, %v328_v28  ;;  %vm335_vm2 = vcmp.eq.s32.totalorder %v331_v30, %v328_v28  ;;  %vm336_vm3 = vcmp.lt.s32.totalorder %v332_v31, %v329_v29 }
  0xea   :  { %vm337_vm4 = vmand %vm335_vm2, %vm336_vm3 }
  0xeb   :  { %vm338_vm5 = vmor %vm334_vm1, %vm337_vm4 }
  0xec   :  { %v339_v32 = vsel %vm338_vm5, %v331_v30, %v328_v28  ;;  %v340_v33 = vsel %vm338_vm5, %v332_v31, %v329_v29 }
  0xed   :  { %v342_v34 = vrot.slane %v339_v32, 1  ;;  %v343_v35 = vrot.slane %v340_v33, 1 }
  0xef   :  { %vm345_vm6 = vcmp.gt.s32.totalorder %v342_v34, %v339_v32  ;;  %vm346_vm7 = vcmp.eq.s32.totalorder %v342_v34, %v339_v32  ;;  %vm347_vm8 = vcmp.lt.s32.totalorder %v343_v35, %v340_v33 }
  0xf0   :  { %vm348_vm9 = vmand %vm346_vm7, %vm347_vm8 }
  0xf1   :  { %vm349_vm10 = vmor %vm345_vm6, %vm348_vm9 }
  0xf2   :  { %v350_v36 = vsel %vm349_vm10, %v342_v34, %v339_v32  ;;  %v351_v37 = vsel %vm349_vm10, %v343_v35, %v340_v33  ;;  %vm1123_vm10 = vcmp.ne.s32.totalorder %v567_v54, 0 }
  0xf3   :  { %v353_v38 = vrot.slane %v350_v36, 1  ;;  %v354_v39 = vrot.slane %v351_v37, 1 }
  0xf5   :  { %vm356_vm11 = vcmp.gt.s32.totalorder %v353_v38, %v350_v36  ;;  %vm357_vm12 = vcmp.eq.s32.totalorder %v353_v38, %v350_v36  ;;  %vm358_vm13 = vcmp.lt.s32.totalorder %v354_v39, %v351_v37 }
  0xf6   :  { %vm359_vm14 = vmand %vm357_vm12, %vm358_vm13 }
  0xf7   :  { %vm360_vm15 = vmor %vm356_vm11, %vm359_vm14 }
  0xf8   :  { %v361_v40 = vsel %vm360_vm15, %v353_v38, %v350_v36  ;;  %v362_v41 = vsel %vm360_vm15, %v354_v39, %v351_v37 }
  0xf9   :  { %v364_v42 = vrot.slane %v361_v40, 1  ;;  %v365_v43 = vrot.slane %v362_v41, 1 }
  0xfb   :  { %vm367_vm0 = vcmp.gt.s32.totalorder %v364_v42, %v361_v40  ;;  %vm368_vm1 = vcmp.eq.s32.totalorder %v364_v42, %v361_v40  ;;  %vm369_vm2 = vcmp.lt.s32.totalorder %v365_v43, %v362_v41 }
  0xfc   :  { %vm370_vm3 = vmand %vm368_vm1, %vm369_vm2 }
  0xfd   :  { %vm371_vm4 = vmor %vm367_vm0, %vm370_vm3 }
  0xfe   :  { %v373_v44 = vsel %vm371_vm4, %v365_v43, %v362_v41  ;;  %v372_v45 = vsel %vm371_vm4, %v364_v42, %v361_v40 }
  0xff   :  { %380 = vxpose.xlu0.b32.start.end [1/1] (short) (narrow) %v373_v44, 8  ;;  %376 = vst [vmem:[#allocation13] sm:$0x1] %v372_v45  ;;  %378 = vst [vmem:[#allocation15] sm:$0x1] %v373_v44 }
 0x106   :  { %v509_v51 = vld [vmem:[#allocation13 + $0x7] ss:$-1 sm:$0xff]  ;;  %v515_v52 = vld [vmem:[#allocation15 + $0x7] ss:$-1 sm:$0xff] }
 0x107   :  { %vm1043_vm5 = vcmp.lt.s32.totalorder %v509_v51, 2147483648  ;;  %vm1044_vm6 = vcmp.eq.s32.totalorder %v509_v51, 2147483648  ;;  %vm1045_vm7 = vcmp.gt.s32.totalorder %v515_v52, 2147483647 }
 0x108   :  { %vm530_vm8 = vmand %vm1044_vm6, %vm1045_vm7  ;;  %vm1135_vm6 = vcmp.ne.s32.totalorder %v595_v6, 0 }
 0x109   :  { %vm531_vm9 = vmor %vm1043_vm5, %vm530_vm8 }
 0x10a   :  { %v532_v56 = vsel %vm531_vm9, 2147483648, %v509_v51  ;;  %v534_v57 = vsel %vm531_vm9, %v509_v51, 2147483648  ;;  %v536_v58 = vsel %vm531_vm9, 2147483647, %v515_v52  ;;  %v538_v59 = vsel %vm531_vm9, %v515_v52, 2147483647 }
 0x10b   :  { %v551_v60 = vrot.slane %v532_v56, %v1116_v53  ;;  %v558_v61 = vrot.slane %v536_v58, %v1116_v53  ;;  %v732_v62 = vrot.slane %v534_v57, %v1116_v53  ;;  %v739_v63 = vrot.slane %v538_v59, %v1116_v53 }
 0x10d   :  { %vm560_vm11 = vcmp.gt.s32.totalorder %v532_v56, %v551_v60  ;;  %vm561_vm12 = vcmp.eq.s32.totalorder %v532_v56, %v551_v60  ;;  %vm562_vm13 = vcmp.lt.s32.totalorder %v536_v58, %v558_v61  ;;  %vm742_vm15 = vcmp.eq.s32.totalorder %v534_v57, %v732_v62 }
 0x10e   :  { %vm563_vm14 = vmand %vm561_vm12, %vm562_vm13  ;;  %vm743_vm0 = vcmp.lt.s32.totalorder %v538_v59, %v739_v63  ;;  %vm741_vm2 = vcmp.gt.s32.totalorder %v534_v57, %v732_v62 }
 0x10f   :  { %vm564_vm1 = vmor %vm560_vm11, %vm563_vm14 }
 0x110   :  { %vm569_vm3 = vmxor %vm564_vm1, %vm1123_vm10 }
 0x111   :  { %v570_v8 = vsel %vm569_vm3, %v532_v56, %v551_v60  ;;  %v571_v9 = vsel %vm569_vm3, %v536_v58, %v558_v61  ;;  %vm744_vm4 = vmand %vm742_vm15, %vm743_vm0 }
 0x112   :  { %v579_v10 = vrot.slane %v570_v8, %v1128_v5  ;;  %v586_v11 = vrot.slane %v571_v9, %v1128_v5  ;;  %vm745_vm5 = vmor %vm741_vm2, %vm744_vm4  ;;  %vm1151_vm4 = vcmp.ne.s32.totalorder %v623_v19, 0 }
 0x113   :  { %vm750_vm7 = vmxor %vm745_vm5, %vm1123_vm10 }
 0x114   :  { %vm588_vm8 = vcmp.gt.s32.totalorder %v570_v8, %v579_v10  ;;  %vm589_vm9 = vcmp.eq.s32.totalorder %v570_v8, %v579_v10  ;;  %vm590_vm11 = vcmp.lt.s32.totalorder %v571_v9, %v586_v11  ;;  %v751_v13 = vsel %vm750_vm7, %v534_v57, %v732_v62 }
 0x115   :  { %vm591_vm12 = vmand %vm589_vm9, %vm590_vm11  ;;  %v752_v16 = vsel %vm750_vm7, %v538_v59, %v739_v63  ;;  %v760_v17 = vrot.slane %v751_v13, %v1128_v5 }
 0x116   :  { %vm592_vm13 = vmor %vm588_vm8, %vm591_vm12  ;;  %v767_v18 = vrot.slane %v752_v16, %v1128_v5 }
 0x117   :  { %vm597_vm14 = vmxor %vm592_vm13, %vm1135_vm6  ;;  %vm769_vm15 = vcmp.gt.s32.totalorder %v751_v13, %v760_v17  ;;  %vm770_vm0 = vcmp.eq.s32.totalorder %v751_v13, %v760_v17 }
 0x118   :  { %v598_v20 = vsel %vm597_vm14, %v570_v8, %v579_v10  ;;  %v599_v21 = vsel %vm597_vm14, %v571_v9, %v586_v11  ;;  %vm771_vm1 = vcmp.lt.s32.totalorder %v752_v16, %v767_v18 }
 0x119   :  { %v607_v22 = vrot.slane %v598_v20, %v1142_v14  ;;  %v614_v23 = vrot.slane %v599_v21, %v1142_v14  ;;  %vm772_vm2 = vmand %vm770_vm0, %vm771_vm1 }
 0x11a   :  { %vm773_vm3 = vmor %vm769_vm15, %vm772_vm2 }
 0x11b   :  { %vm616_vm5 = vcmp.gt.s32.totalorder %v598_v20, %v607_v22  ;;  %vm617_vm7 = vcmp.eq.s32.totalorder %v598_v20, %v607_v22  ;;  %vm618_vm8 = vcmp.lt.s32.totalorder %v599_v21, %v614_v23  ;;  %vm778_vm9 = vmxor %vm773_vm3, %vm1135_vm6 }
 0x11c   :  { %vm619_vm11 = vmand %vm617_vm7, %vm618_vm8  ;;  %v779_v2 = vsel %vm778_vm9, %v751_v13, %v760_v17  ;;  %v780_v25 = vsel %vm778_vm9, %v752_v16, %v767_v18 }
 0x11d   :  { %vm620_vm12 = vmor %vm616_vm5, %vm619_vm11  ;;  %v788_v26 = vrot.slane %v779_v2, %v1142_v14  ;;  %v795_v27 = vrot.slane %v780_v25, %v1142_v14 }
 0x11e   :  { %vm625_vm13 = vmxor %vm620_vm12, %vm1151_vm4 }
 0x11f   :  { %v626_v28 = vsel %vm625_vm13, %v598_v20, %v607_v22  ;;  %v627_v29 = vsel %vm625_vm13, %v599_v21, %v614_v23  ;;  %vm797_vm14 = vcmp.gt.s32.totalorder %v779_v2, %v788_v26  ;;  %vm798_vm15 = vcmp.eq.s32.totalorder %v779_v2, %v788_v26 }
 0x120   :  { %v641_v30 = vrot.slane %v626_v28, %v1116_v53  ;;  %v648_v31 = vrot.slane %v627_v29, %v1116_v53  ;;  %vm799_vm0 = vcmp.lt.s32.totalorder %v780_v25, %v795_v27 }
 0x121   :  { %vm800_vm1 = vmand %vm798_vm15, %vm799_vm0 }
 0x122   :  { %vm650_vm2 = vcmp.gt.s32.totalorder %v626_v28, %v641_v30  ;;  %vm651_vm3 = vcmp.eq.s32.totalorder %v626_v28, %v641_v30  ;;  %vm652_vm5 = vcmp.lt.s32.totalorder %v627_v29, %v648_v31  ;;  %vm801_vm7 = vmor %vm797_vm14, %vm800_vm1 }
 0x123   :  { %vm653_vm8 = vmand %vm651_vm3, %vm652_vm5 }
 0x124   :  { %vm654_vm9 = vmor %vm650_vm2, %vm653_vm8 }
 0x125   :  { %vm659_vm11 = vmxor %vm654_vm9, %vm1123_vm10 }
 0x126   :  { %v660_v32 = vsel %vm659_vm11, %v626_v28, %v641_v30  ;;  %v661_v33 = vsel %vm659_vm11, %v627_v29, %v648_v31  ;;  %vm806_vm12 = vmxor %vm801_vm7, %vm1151_vm4 }
 0x127   :  { %v669_v34 = vrot.slane %v660_v32, %v1128_v5  ;;  %v676_v35 = vrot.slane %v661_v33, %v1128_v5  ;;  %v807_v36 = vsel %vm806_vm12, %v779_v2, %v788_v26  ;;  %v808_v37 = vsel %vm806_vm12, %v780_v25, %v795_v27 }
 0x128   :  { %v822_v38 = vrot.slane %v807_v36, %v1116_v53  ;;  %v829_v39 = vrot.slane %v808_v37, %v1116_v53 }
 0x129   :  { %vm678_vm13 = vcmp.gt.s32.totalorder %v660_v32, %v669_v34  ;;  %vm679_vm14 = vcmp.eq.s32.totalorder %v660_v32, %v669_v34  ;;  %vm680_vm15 = vcmp.lt.s32.totalorder %v661_v33, %v676_v35 }
 0x12a   :  { %vm681_vm0 = vmand %vm679_vm14, %vm680_vm15  ;;  %vm832_vm1 = vcmp.eq.s32.totalorder %v807_v36, %v822_v38  ;;  %vm833_vm2 = vcmp.lt.s32.totalorder %v808_v37, %v829_v39  ;;  %vm831_vm5 = vcmp.gt.s32.totalorder %v807_v36, %v822_v38 }
 0x12b   :  { %vm682_vm3 = vmor %vm678_vm13, %vm681_vm0 }
 0x12c   :  { %vm687_vm7 = vmxor %vm682_vm3, %vm1135_vm6 }
 0x12d   :  { %v688_v40 = vsel %vm687_vm7, %v660_v32, %v669_v34  ;;  %v689_v41 = vsel %vm687_vm7, %v661_v33, %v676_v35  ;;  %vm834_vm8 = vmand %vm832_vm1, %vm833_vm2 }
 0x12e   :  { %v697_v42 = vrot.slane %v688_v40, %v1142_v14  ;;  %v704_v43 = vrot.slane %v689_v41, %v1142_v14  ;;  %vm835_vm9 = vmor %vm831_vm5, %vm834_vm8 }
 0x12f   :  { %vm840_vm11 = vmxor %vm835_vm9, %vm1123_vm10 }
 0x130   :  { %vm706_vm12 = vcmp.gt.s32.totalorder %v688_v40, %v697_v42  ;;  %vm707_vm14 = vcmp.eq.s32.totalorder %v688_v40, %v697_v42  ;;  %vm708_vm15 = vcmp.lt.s32.totalorder %v689_v41, %v704_v43  ;;  %v841_v44 = vsel %vm840_vm11, %v807_v36, %v822_v38 }
 0x131   :  { %vm709_vm13 = vmand %vm707_vm14, %vm708_vm15  ;;  %v842_v45 = vsel %vm840_vm11, %v808_v37, %v829_v39  ;;  %v850_v46 = vrot.slane %v841_v44, %v1128_v5 }
 0x132   :  { %vm710_vm0 = vmor %vm706_vm12, %vm709_vm13  ;;  %v857_v47 = vrot.slane %v842_v45, %v1128_v5 }
 0x133   :  { %vm715_vm1 = vmxor %vm710_vm0, %vm1151_vm4  ;;  %vm859_vm2 = vcmp.gt.s32.totalorder %v841_v44, %v850_v46  ;;  %vm860_vm3 = vcmp.eq.s32.totalorder %v841_v44, %v850_v46 }
 0x134   :  { %v1181_v48 = vsel %vm715_vm1, %v688_v40, %v697_v42  ;;  %v1183_v49 = vsel %vm715_vm1, %v689_v41, %v704_v43  ;;  %vm861_vm10 = vcmp.lt.s32.totalorder %v842_v45, %v857_v47 }
 0x135   :  { %vm862_vm5 = vmand %vm860_vm3, %vm861_vm10  ;;  %928 = vxpose.xlu0.b32.start.end [1/1] (short) (narrow) %v1183_v49, 8  ;;  %v905_v5 = vsub.s32 2147483647, %v1181_v48 }
 0x136   :  { %vm863_vm7 = vmor %vm859_vm2, %vm862_vm5  ;;  %vm904_vm2 = vcmp.lt.s32.totalorder %v1181_v48, 0 }
 0x137   :  { %vm868_vm8 = vmxor %vm863_vm7, %vm1135_vm6  ;;  %v906_v6 = vsel %vm904_vm2, %v905_v5, %v1181_v48 }
 0x138   :  { %v869_v50 = vsel %vm868_vm8, %v841_v44, %v850_v46  ;;  %v870_v51 = vsel %vm868_vm8, %v842_v45, %v857_v47 }
 0x139   :  { %v878_v52 = vrot.slane %v869_v50, %v1142_v14  ;;  %v885_v53 = vrot.slane %v870_v51, %v1142_v14  ;;  %909 = vxpose.xlu0.b32.start.end [1/1] (short) (narrow) %v906_v6, 8 }
 0x13b   :  { %vm887_vm9 = vcmp.gt.s32.totalorder %v869_v50, %v878_v52  ;;  %vm888_vm11 = vcmp.eq.s32.totalorder %v869_v50, %v878_v52  ;;  %vm889_vm12 = vcmp.lt.s32.totalorder %v870_v51, %v885_v53 }
 0x13c   :  { %vm890_vm14 = vmand %vm888_vm11, %vm889_vm12 }
 0x13d   :  { %vm891_vm15 = vmor %vm887_vm9, %vm890_vm14 }
 0x13e   :  { %vm896_vm13 = vmxor %vm891_vm15, %vm1151_vm4 }
 0x13f   :  { %v897_v54 = vsel %vm896_vm13, %v869_v50, %v878_v52  ;;  %v898_v55 = vsel %vm896_vm13, %v870_v51, %v885_v53 }
 0x140   :  { %900 = vst [vmem:[#allocation13] sm:$0xff] %v897_v54  ;;  %901 = vst [vmem:[#allocation15] sm:$0xff] %v898_v55 }
 0x17f   :  { %v396_v56 = vpop.trf.xlu0 }
 0x180   :  { %v435_v57 = vrot.slane %v396_v56, 1  ;;  %1046 = vpush %v396_v56 }
 0x182   :  { %1048 = vpush %v435_v57  ;;  %v459_v58 = vrot.slane %v435_v57, 1 }
 0x184   :  { %1050 = vpush %v459_v58  ;;  %v483_v59 = vrot.slane %v459_v58, 1 }
 0x186   :  { %1052 = vpush %v483_v59 }
 0x1b1   :  { %s1047_s0 = spop %1046 }
 0x1b2   :  { %s413_s11 = sshrl.u32 %s1047_s0, 8  ;;  %s415_s12 = ssub.s32 0, %s1047_s0 }
 0x1b3   :  { %p414_p0 = scmp.lt.s32.totalorder %s1047_s0, 0  ;;  %s1027_s13 = smin.u32 %s1047_s0, %s415_s12 }
 0x1b4   :  { %s417_s14 = sand.u32 255, %s1027_s13   ;;  %s1029_s15 = sshll.u32 %s413_s11, 3 }
 0x1b5   :  { %s418_s16 = ssub.s32 0, %s417_s14  ;;  %s1049_s17 = spop %1048  ;;  %v929_v7 = vpop.trf.xlu0 }
 0x1b6   :  { %s1228_s16 = smov (!%p414_p0, %s418_s16), %s417_s14  ;;  %s437_s18 = sshrl.u32 %s1049_s17, 8  ;;  %945 = vst [vmem:[#allocation10] sm:$0xff] %v929_v7 }
 0x1b7   :  { %s420_s19 = sshrl.u32 %s1228_s16, 7  ;;  %s422_s20 = sand.u32 127, %s1228_s16  }
 0x1b8   :  { %s1028_s21 = sshll.u32 %s420_s19, 9  ;;  %s439_s22 = ssub.s32 0, %s1049_s17 }
 0x1b9   :  { %s423_s23 = sadd.s32 %s1028_s21, %s422_s20  ;;  %s1031_s24 = smin.u32 %s1049_s17, %s439_s22  ;;  %v910_v8 = vpop.trf.xlu0 }
 0x1ba   :  { %v425_v60 = vstv %s423_s23  ;;  %p438_p1 = scmp.lt.s32.totalorder %s1049_s17, 0  ;;  %s441_s25 = sand.u32 255, %s1031_s24   ;;  %926 = vst [vmem:[#allocation7] sm:$0xff] %v910_v8 }
 0x1bb   :  { %vm427_vm6 = vcmp.eq.s32.totalorder %v46_v1, %v425_v60  ;;  %s442_s26 = ssub.s32 0, %s441_s25  ;;  %s429_s27 = scalar_lea.vmem [#allocation16], %s1029_s15 }
 0x1bc   :  { %430 = vst.msk [vmem:[%s429_s27] sm:$0xff] %vm427_vm6, %v1085_v15  ;;  %s1230_s26 = smov (!%p438_p1, %s442_s26), %s441_s25  ;;  %s1033_s28 = sshll.u32 %s437_s18, 3 }
 0x1bd   :  { %s1051_s29 = spop %1050  ;;  %s444_s30 = sshrl.u32 %s1230_s26, 7  ;;  %v955_v9 = vld [vmem:[#allocation10] sm:$0xf] }
 0x1be   :  { %s446_s3 = sand.u32 127, %s1230_s26   ;;  %s1032_s4 = sshll.u32 %s444_s30, 9  ;;  %957 = vst [vmem:[#allocation11] sm:$0xf] %v955_v9 }
 0x1bf   :  { %s447_s5 = sadd.s32 %s1032_s4, %s446_s3  ;;  %s463_s6 = ssub.s32 0, %s1051_s29 }
 0x1c0   :  { %v449_v61 = vstv %s447_s5  ;;  %s461_s7 = sshrl.u32 %s1051_s29, 8  ;;  %s1035_s8 = smin.u32 %s1051_s29, %s463_s6 }
 0x1c1   :  { %v450_v62 = vadd.s32 128, %v449_v61  ;;  %p462_p2 = scmp.lt.s32.totalorder %s1051_s29, 0  ;;  %s465_s9 = sand.u32 255, %s1035_s8  }
 0x1c2   :  { %s466_s10 = ssub.s32 0, %s465_s9  ;;  %s1053_s0 = spop %1052 }
 0x1c3   :  { %vm451_vm4 = vcmp.eq.s32.totalorder %v46_v1, %v450_v62  ;;  %s453_s11 = scalar_lea.vmem [#allocation16], %s1033_s28  ;;  %s1232_s10 = smov (!%p462_p2, %s466_s10), %s465_s9 }
 0x1c4   :  { %454 = vst.msk [vmem:[%s453_s11] sm:$0xff] %vm451_vm4, %v1085_v15  ;;  %s1037_s12 = sshll.u32 %s461_s7, 3  ;;  %s468_s13 = sshrl.u32 %s1232_s10, 7 }
 0x1c5   :  { %s470_s14 = sand.u32 127, %s1232_s10   ;;  %s1036_s15 = sshll.u32 %s468_s13, 9 }
 0x1c6   :  { %s487_s16 = ssub.s32 0, %s1053_s0  ;;  %s471_s17 = sadd.s32 %s1036_s15, %s470_s14 }
 0x1c7   :  { %s1039_s18 = smin.u32 %s1053_s0, %s487_s16  ;;  %v473_v63 = vstv %s471_s17  ;;  %p486_p3 = scmp.lt.s32.totalorder %s1053_s0, 0 }
 0x1c8   :  { %s489_s19 = sand.u32 255, %s1039_s18   ;;  %v474_v0 = vadd.s32 256, %v473_v63  ;;  %s485_s21 = sshrl.u32 %s1053_s0, 8 }
 0x1c9   :  { %s490_s20 = ssub.s32 0, %s489_s19  ;;  %s477_s22 = scalar_lea.vmem [#allocation16], %s1037_s12 }
 0x1ca   :  { %s1234_s20 = smov (!%p486_p3, %s490_s20), %s489_s19  ;;  %vm475_vm0 = vcmp.eq.s32.totalorder %v46_v1, %v474_v0  ;;  %s1041_s27 = sshll.u32 %s485_s21, 3 }
 0x1cb   :  { %478 = vst.msk [vmem:[%s477_s22] sm:$0xff] %vm475_vm0, %v1085_v15  ;;  %s492_s23 = sshrl.u32 %s1234_s20, 7  ;;  %s494_s24 = sand.u32 127, %s1234_s20  }
 0x1cc   :  { %s1040_s25 = sshll.u32 %s492_s23, 9  ;;  %s501_s28 = scalar_lea.vmem [#allocation16], %s1041_s27 }
 0x1cd   :  { %s495_s26 = sadd.s32 %s1040_s25, %s494_s24  ;;  %s1090_s29 = smov [#allocation8]  }
 0x1ce   :  { %v497_v3 = vstv %s495_s26  ;;  %s962_s30 = sshll.u32 %s1090_s29, 4  ;;  %s963_s30 = int_to_ptr.vmem [resolvable:$true] %s962_s30 }
 0x1cf   :  { %v498_v4 = vadd.s32 384, %v497_v3  ;;  %s1061_s3 = scalar_lea.vmem %s963_s30, 64  ;;  %p1066_p5 = scmp.lt.s32.totalorder %s963_s30, %s963_s30 }
 0x1d0   :  { %p1062_p4 = scmp.ne.s32.totalorder %s963_s30, %s1061_s3  ;;  %p1067_p6 = scmp.lt.s32.totalorder %s1061_s3, %s1061_s3 }
 0x1d1   :  { %vm499_vm1 = vcmp.eq.s32.totalorder %v46_v1, %v498_v4  ;;  %v949_v1 = vld [vmem:[#allocation7] sm:$0xf] }
 0x1d2   :  { %502 = vst.msk [vmem:[%s501_s28] sm:$0xff] %vm499_vm1, %v1085_v15  ;;  %951 = vst [vmem:[#allocation8] sm:$0xf] %v949_v1  ;;  %p1068_p7 = por %p1067_p6, %p1066_p5 }
 0x1d4   :  { %p1069_p8 = pnand %p1068_p7, %p1062_p4 }
 0x1d6   :  { %1072 = shalt.err (!%p1069_p8)
}
 0x1d7   :  { %s1073_s6 = scalar_lea.hbm %s1219_s1, 64 }
 0x1d8   :  { %p1074_p9 = scmp.ne.s32.totalorder %s1219_s1, %s1073_s6  ;;  %p1077_p10 = scmp.lt.u32.totalorder %s1073_s6, %s1219_s1 }
 0x1da   :  { %p1079_p11 = pnand %p1077_p10, %p1074_p9 }
 0x1dc   :  { %1082 = shalt.err (!%p1079_p11)
}
 0x1dd   :  { %965 = dma.vmem_to_hbm [thread:$0]  %s963_s30, 64, %s1219_s1, [#allocation9]   ;;  %v981_v15 = vld [vmem:[#allocation11] sm:$0xf] }
 0x1de   :  { %982 = vst [vmem:[%s1220_s2] sm:$0xf] %v981_v15 }
 0x1df   :  { %1083 = dma.done.wait [#allocation9], 64  }
 0x1e0   :  { %1084 = vsyncadd [#allocation9], 4294967232 }
 0x1e1   :  { %998 = vsyncpa [#allocation9], 1 }

// kernel: gcn_forward.2
= control target key start
LH: loop header
LB: loop body
LE: loop exit
PB: predicated region body
PF: predicated region fallthrough
CT: control target
= control target key end

     0   :  { %vm56_vm0 = vcmask 523264   ;;  %s1940_s25 = smov 127   ;;  %s2422_s2 = inlined_call_operand.vmem [shape: f32[64,128], index: 2, kind: input, shape index: {}]   ;;  %s2423_s0 = inlined_call_operand.vmem [shape: f32[64,64], index: 0, kind: input, shape index: {}]   ;;  %s2424_s3 = inlined_call_operand.vmem [shape: f32[128,128], index: 3, kind: input, shape index: {}]   ;;  %s2425_s5 = inlined_call_operand.vmem [shape: f32[128,128], index: 5, kind: input, shape index: {}]   ;;  %s2426_s4 = inlined_call_operand.vmem [shape: f32[1,128], index: 4, kind: input, shape index: {}]   ;;  %s2427_s7 = inlined_call_operand.vmem [shape: f32[128,128], index: 7, kind: input, shape index: {}]   ;;  %s2428_s6 = inlined_call_operand.vmem [shape: f32[1,128], index: 6, kind: input, shape index: {}]   ;;  %s2429_s9 = inlined_call_operand.vmem [shape: f32[128,2], index: 9, kind: input, shape index: {}]   ;;  %s2430_s8 = inlined_call_operand.vmem [shape: f32[1,128], index: 8, kind: input, shape index: {}]   ;;  %s2431_s1 = inlined_call_operand.vmem [shape: f32[64,64], index: 1, kind: input, shape index: {}]   ;;  %s2432_s10 = inlined_call_operand.<no memory space> [shape: f32[1,1], index: 10, kind: input, shape index: {}]   ;;  %s2433_s11 = inlined_call_operand.vmem [shape: f32[64,128], index: 11, kind: output, shape index: {}]  }
   0x1   :  { %v48_v0 = vld [vmem:[%s2422_s2] sm:$0xff]  ;;  %v49_v1 = vld [vmem:[%s2422_s2 + $0x8] sm:$0xff]  ;;  %v50_v2 = vld [vmem:[%s2422_s2 + $0x10] sm:$0xff] }
   0x2   :  { %v1680_v3 = vpack.c.bf16 %v49_v1, %v48_v0  ;;  %v51_v4 = vld [vmem:[%s2422_s2 + $0x18] sm:$0xff]  ;;  %v52_v6 = vld [vmem:[%s2422_s2 + $0x20] sm:$0xff]  ;;  %v53_v7 = vld [vmem:[%s2422_s2 + $0x28] sm:$0xff] }
   0x3   :  { %v1684_v5 = vpack.c.bf16 %v51_v4, %v50_v2  ;;  %v2023_v8 = vld [vmem:[%s2423_s0] sm:$0xff]  ;;  %v1688_v9 = vpack.c.bf16 %v53_v7, %v52_v6  ;;  %v54_v10 = vld [vmem:[%s2422_s2 + $0x30] sm:$0xff]  ;;  %v187_v12 = vld [vmem:[%s2424_s3 + $0x8] sm:$0xff] }
   0x4   :  { %1681 = vmatprep.subr.bf16.mxu0 %v1680_v3  ;;  %1408 = vmatprep.mubr.msk.f32.mxu0 %vm56_vm0, %v2023_v8  ;;  %v186_v11 = vld [vmem:[%s2424_s3] sm:$0xff]  ;;  %v55_v13 = vld [vmem:[%s2422_s2 + $0x38] sm:$0xff]  ;;  %v188_v15 = vld [vmem:[%s2424_s3 + $0x10] sm:$0xff] }
   0x5   :  { %1683 = vmatpush3.bf16.msra.mxu0 %v1680_v3  ;;  %v1696_v14 = vpack.c.bf16 %v187_v12, %v186_v11  ;;  %v189_v16 = vld [vmem:[%s2424_s3 + $0x18] sm:$0xff]  ;;  %v190_v18 = vld [vmem:[%s2424_s3 + $0x20] sm:$0xff]  ;;  %v191_v19 = vld [vmem:[%s2424_s3 + $0x28] sm:$0xff]  ;;  %v1692_v20 = vpack.c.bf16 %v55_v13, %v54_v10 }
   0x6   :  { %1685 = vmatprep.subr.bf16.mxu0 %v1684_v5  ;;  %v1700_v17 = vpack.c.bf16 %v189_v16, %v188_v15  ;;  %v1704_v21 = vpack.c.bf16 %v191_v19, %v190_v18  ;;  %v192_v22 = vld [vmem:[%s2424_s3 + $0x30] sm:$0xff]  ;;  %v193_v23 = vld [vmem:[%s2424_s3 + $0x38] sm:$0xff]  ;;  %v194_v25 = vld [vmem:[%s2424_s3 + $0x40] sm:$0xff] }
   0x7   :  { %1697 = vmatprep.subr.bf16.mxu1 %v1696_v14  ;;  %v1708_v24 = vpack.c.bf16 %v193_v23, %v192_v22  ;;  %v195_v26 = vld [vmem:[%s2424_s3 + $0x48] sm:$0xff]  ;;  %v2071_v28 = vld [vmem:[%s2423_s0 + $0x10] sm:$0xff]  ;;  %v197_v31 = vld [vmem:[%s2424_s3 + $0x58] sm:$0xff] }
   0x8   :  { %1699 = vmatpush3.bf16.msra.mxu1 %v1696_v14  ;;  %v2066_v27 = vld [vmem:[%s2423_s0 + $0x8] sm:$0xff]  ;;  %v1712_v29 = vpack.c.bf16 %v195_v26, %v194_v25  ;;  %v196_v30 = vld [vmem:[%s2424_s3 + $0x50] sm:$0xff]  ;;  %v2086_v32 = vld [vmem:[%s2423_s0 + $0x18] sm:$0xff] }
   0x9   :  { %1687 = vmatpush3.bf16.msra.mxu0 %v1684_v5  ;;  %1701 = vmatprep.subr.bf16.mxu1 %v1700_v17  ;;  %v2091_v33 = vld [vmem:[%s2423_s0 + $0x20] sm:$0xff]  ;;  %v1716_v34 = vpack.c.bf16 %v197_v31, %v196_v30  ;;  %v199_v36 = vld [vmem:[%s2424_s3 + $0x68] sm:$0xff]  ;;  %v2111_v38 = vld [vmem:[%s2423_s0 + $0x30] sm:$0xff] }
   0xa   :  { %1689 = vmatprep.subr.bf16.mxu0 %v1688_v9  ;;  %v198_v35 = vld [vmem:[%s2424_s3 + $0x60] sm:$0xff]  ;;  %v2106_v37 = vld [vmem:[%s2423_s0 + $0x28] sm:$0xff]  ;;  %v200_v40 = vld [vmem:[%s2424_s3 + $0x70] sm:$0xff] }
   0xb   :  { %v1720_v39 = vpack.c.bf16 %v199_v36, %v198_v35  ;;  %v201_v41 = vld [vmem:[%s2424_s3 + $0x78] sm:$0xff]  ;;  %v322_v44 = vld [vmem:[%s2425_s5] sm:$0xff]  ;;  %v323_v45 = vld [vmem:[%s2425_s5 + $0x8] sm:$0xff] }
   0xc   :  { %1703 = vmatpush3.bf16.msra.mxu1 %v1700_v17  ;;  %v2126_v42 = vld [vmem:[%s2423_s0 + $0x38] sm:$0xff]  ;;  %v1724_v43 = vpack.c.bf16 %v201_v41, %v200_v40  ;;  %v324_v46 = vld [vmem:[%s2425_s5 + $0x10] sm:$0xff]  ;;  %v1728_v47 = vpack.c.bf16 %v323_v45, %v322_v44  ;;  %v326_v50 = vld [vmem:[%s2425_s5 + $0x20] sm:$0xff] }
   0xd   :  { %1691 = vmatpush3.bf16.msra.mxu0 %v1688_v9  ;;  %1705 = vmatprep.subr.bf16.mxu1 %v1704_v21  ;;  %v325_v48 = vld [vmem:[%s2425_s5 + $0x18] sm:$0xff]  ;;  %v327_v51 = vld [vmem:[%s2425_s5 + $0x28] sm:$0xff]  ;;  %v328_v53 = vld [vmem:[%s2425_s5 + $0x30] sm:$0xff] }
   0xe   :  { %1693 = vmatprep.subr.bf16.mxu0 %v1692_v20  ;;  %v1732_v49 = vpack.c.bf16 %v325_v48, %v324_v46  ;;  %v1736_v52 = vpack.c.bf16 %v327_v51, %v326_v50  ;;  %v329_v54 = vld [vmem:[%s2425_s5 + $0x38] sm:$0xff]  ;;  %v330_v0 = vld [vmem:[%s2425_s5 + $0x40] sm:$0xff]  ;;  %v331_v1 = vld [vmem:[%s2425_s5 + $0x48] sm:$0xff] }
   0xf   :  { %v1740_v55 = vpack.c.bf16 %v329_v54, %v328_v53  ;;  %v1744_v2 = vpack.c.bf16 %v331_v1, %v330_v0  ;;  %v332_v3 = vld [vmem:[%s2425_s5 + $0x50] sm:$0xff]  ;;  %v333_v4 = vld [vmem:[%s2425_s5 + $0x58] sm:$0xff]  ;;  %v334_v6 = vld [vmem:[%s2425_s5 + $0x60] sm:$0xff] }
  0x10   :  { %1707 = vmatpush3.bf16.msra.mxu1 %v1704_v21  ;;  %v1748_v5 = vpack.c.bf16 %v333_v4, %v332_v3  ;;  %v335_v7 = vld [vmem:[%s2425_s5 + $0x68] sm:$0xff]  ;;  %v336_v10 = vld [vmem:[%s2425_s5 + $0x70] sm:$0xff]  ;;  %v337_v11 = vld [vmem:[%s2425_s5 + $0x78] sm:$0xff] }
  0x11   :  { %1695 = vmatpush3.bf16.msra.mxu0 %v1692_v20  ;;  %1709 = vmatprep.subr.bf16.mxu1 %v1708_v24  ;;  %v1752_v9 = vpack.c.bf16 %v335_v7, %v334_v6  ;;  %v1756_v12 = vpack.c.bf16 %v337_v11, %v336_v10  ;;  %v1204_v13 = vld [vmem:[%s2426_s4] ss:$0 sm:$0xff]  ;;  %v564_v46 = vld [vmem:[%s2427_s7 + $0x8] sm:$0xff]  ;;  %v569_v54 = vld [vmem:[%s2427_s7 + $0x30] sm:$0xff] }
  0x12   :  { %1729 = vmatprep.subr.bf16.mxu0 %v1728_v47  ;;  %v563_v45 = vld [vmem:[%s2427_s7] sm:$0xff]  ;;  %v572_v6 = vld [vmem:[%s2427_s7 + $0x48] sm:$0xff]  ;;  %v574_v10 = vld [vmem:[%s2427_s7 + $0x58] sm:$0xff] }
  0x13   :  { %v1776_v48 = vpack.c.bf16 %v564_v46, %v563_v45  ;;  %v567_v51 = vld [vmem:[%s2427_s7 + $0x20] sm:$0xff] }
  0x14   :  { %1409 = vmatmul.mubr.msk.f32.vlgmr.msra.gmra.mrb[0].mxu0 %vm56_vm0, %v2066_v27  ;;  %1711 = vmatpush3.bf16.msra.mxu1 %v1708_v24  ;;  %v575_v11 = vld [vmem:[%s2427_s7 + $0x60] sm:$0xff] }
  0x15   :  { %1411 = vmatprep.mubr.msk.f32.mxu0 %vm56_vm0, %v2071_v28  ;;  %1713 = vmatprep.subr.bf16.mxu1 %v1712_v29 }
  0x16   :  { %1731 = vmatpush3.bf16.msra.mxu0 %v1728_v47  ;;  %v565_v47 = vld [vmem:[%s2427_s7 + $0x10] sm:$0xff] }
  0x17   :  { %1733 = vmatprep.subr.bf16.mxu0 %v1732_v49 }
  0x18   :  { %1412 = vmatmul.mubr.msk.f32.gmra.mrb[2].mxu0 %vm56_vm0, %v2086_v32  ;;  %1715 = vmatpush3.bf16.msra.mxu1 %v1712_v29 }
  0x19   :  { %1414 = vmatprep.mubr.msk.f32.mxu0 %vm56_vm0, %v2091_v33  ;;  %1717 = vmatprep.subr.bf16.mxu1 %v1716_v34 }
  0x1a   :  { %1735 = vmatpush3.bf16.msra.mxu0 %v1732_v49  ;;  %v566_v49 = vld [vmem:[%s2427_s7 + $0x18] sm:$0xff] }
  0x1b   :  { %1737 = vmatprep.subr.bf16.mxu0 %v1736_v52  ;;  %v1780_v50 = vpack.c.bf16 %v566_v49, %v565_v47 }
  0x1c   :  { %1415 = vmatmul.mubr.msk.f32.gmra.mrb[4].mxu0 %vm56_vm0, %v2106_v37  ;;  %1719 = vmatpush3.bf16.msra.mxu1 %v1716_v34 }
  0x1d   :  { %1417 = vmatprep.mubr.msk.f32.mxu0 %vm56_vm0, %v2111_v38  ;;  %1721 = vmatprep.subr.bf16.mxu1 %v1720_v39 }
  0x1e   :  { %1739 = vmatpush3.bf16.msra.mxu0 %v1736_v52  ;;  %v568_v52 = vld [vmem:[%s2427_s7 + $0x28] sm:$0xff] }
  0x1f   :  { %1741 = vmatprep.subr.bf16.mxu0 %v1740_v55  ;;  %v1784_v53 = vpack.c.bf16 %v568_v52, %v567_v51 }
  0x20   :  { %1418 = vmatmul.mubr.msk.f32.gmra.mrb[6].mxu0 %vm56_vm0, %v2126_v42  ;;  %1723 = vmatpush3.bf16.msra.mxu1 %v1720_v39 }
  0x21   :  { %1725 = vmatprep.subr.bf16.mxu1 %v1724_v43 }
  0x22   :  { %1743 = vmatpush3.bf16.msra.mxu0 %v1740_v55  ;;  %v570_v55 = vld [vmem:[%s2427_s7 + $0x38] sm:$0xff] }
  0x23   :  { %1745 = vmatprep.subr.bf16.mxu0 %v1744_v2 }
  0x24   :  { %1727 = vmatpush3.bf16.msra.mxu1 %v1724_v43 }
  0x26   :  { %1747 = vmatpush3.bf16.msra.mxu0 %v1744_v2 }
  0x27   :  { %1749 = vmatprep.subr.bf16.mxu0 %v1748_v5 }
  0x2a   :  { %1751 = vmatpush3.bf16.msra.mxu0 %v1748_v5  ;;  %v571_v5 = vld [vmem:[%s2427_s7 + $0x40] sm:$0xff] }
  0x2b   :  { %1753 = vmatprep.subr.bf16.mxu0 %v1752_v9  ;;  %v1792_v7 = vpack.c.bf16 %v572_v6, %v571_v5  ;;  %v810_v6 = vld [vmem:[%s2429_s9 + $0x30] sm:$0xff] }
  0x2e   :  { %1755 = vmatpush3.bf16.msra.mxu0 %v1752_v9  ;;  %v573_v9 = vld [vmem:[%s2427_s7 + $0x50] sm:$0xff] }
  0x2f   :  { %1757 = vmatprep.subr.bf16.mxu0 %v1756_v12 }
  0x32   :  { %1759 = vmatpush3.bf16.msra.mxu0 %v1756_v12  ;;  %v576_v12 = vld [vmem:[%s2427_s7 + $0x68] sm:$0xff] }
  0x33   :  { %1777 = vmatprep.subr.bf16.mxu0 %v1776_v48 }
  0xe7   :  { %v1410_v56 = vpop.f32.mrb[0].mxu0 }
  0xe8   :  { %v147_v57 = vpop.f32.mrb[1].mxu0 }
  0xe9   :  { %1452 = vmatprep.mubr.f32.mxu1 %v147_v57 }
  0xea   :  { %1453 = vmatmul.mubr.f32.vlgmr.msra.gmra.mrb[0].mxu1 %v1410_v56  ;;  %v1788_v56 = vpack.c.bf16 %v570_v55, %v569_v54 }
  0xeb   :  { %v1413_v58 = vpop.f32.mrb[2].mxu0 }
  0xec   :  { %v157_v59 = vpop.f32.mrb[3].mxu0 }
  0xed   :  { %1455 = vmatprep.mubr.f32.mxu1 %v157_v59 }
  0xee   :  { %1456 = vmatmul.mubr.f32.gmra.mrb[2].mxu1 %v1413_v58 }
  0xef   :  { %v1416_v60 = vpop.f32.mrb[4].mxu0 }
  0xf0   :  { %v167_v61 = vpop.f32.mrb[5].mxu0 }
  0xf1   :  { %1458 = vmatprep.mubr.f32.mxu1 %v167_v61 }
  0xf2   :  { %1459 = vmatmul.mubr.f32.gmra.mrb[4].mxu1 %v1416_v60 }
  0xf3   :  { %v1419_v62 = vpop.f32.mrb[6].mxu0 }
  0xf4   :  { %v177_v63 = vpop.f32.mrb[7].mxu0 }
  0xf5   :  { %1461 = vmatprep.mubr.f32.mxu1 %v177_v63 }
  0xf6   :  { %1462 = vmatmul.mubr.f32.gmra.mrb[6].mxu1 %v1419_v62 }
  0xf7   :  { %1524 = vmatprep.mubr.msk.f32.mxu1 %vm56_vm0, %v2023_v8 }
 0x1bd   :  { %v1454_v14 = vpop.f32.mrb[0].mxu1 }
 0x1be   :  { %v281_v15 = vadd.f32 %v1454_v14, %v1204_v13  ;;  %v275_v16 = vpop.f32.mrb[1].mxu1  ;;  %v577_v14 = vld [vmem:[%s2427_s7 + $0x70] sm:$0xff] }
 0x1bf   :  { %v276_v17 = vadd.f32 %v1204_v13, %v275_v16 }
 0x1c1   :  { %1876 = vtanh.f32 %v276_v17  ;;  %v1457_v18 = vpop.f32.mrb[2].mxu1  ;;  %v1205_v17 = vld [vmem:[%s2428_s6] ss:$0 sm:$0xff] }
 0x1c2   :  { %1878 = vtanh.f32 %v281_v15  ;;  %v291_v19 = vadd.f32 %v1457_v18, %v1204_v13  ;;  %v285_v20 = vpop.f32.mrb[3].mxu1  ;;  %v578_v15 = vld [vmem:[%s2427_s7 + $0x78] sm:$0xff] }
 0x1c3   :  { %v286_v21 = vadd.f32 %v1204_v13, %v285_v20  ;;  %v1804_v16 = vpack.c.bf16 %v578_v15, %v577_v14  ;;  %v1214_v14 = vld [vmem:[%s2430_s8] ss:$0 sm:$0xff] }
 0x1c5   :  { %1880 = vtanh.f32 %v286_v21  ;;  %v1460_v22 = vpop.f32.mrb[4].mxu1 }
 0x1c6   :  { %1882 = vtanh.f32 %v291_v19  ;;  %v301_v23 = vadd.f32 %v1460_v22, %v1204_v13  ;;  %v295_v24 = vpop.f32.mrb[5].mxu1 }
 0x1c7   :  { %v296_v25 = vadd.f32 %v1204_v13, %v295_v24 }
 0x1c9   :  { %1884 = vtanh.f32 %v296_v25  ;;  %v1463_v26 = vpop.f32.mrb[6].mxu1 }
 0x1ca   :  { %1886 = vtanh.f32 %v301_v23  ;;  %v311_v29 = vadd.f32 %v1463_v26, %v1204_v13  ;;  %v305_v30 = vpop.f32.mrb[7].mxu1 }
 0x1cb   :  { %v1877_v31 = vpop.eup %1876  ;;  %v306_v34 = vadd.f32 %v1204_v13, %v305_v30  ;;  %v1800_v13 = vpack.c.bf16 %v576_v12, %v575_v11  ;;  %v818_v11 = vld [vmem:[%s2429_s9 + $0x70] sm:$0xff]  ;;  %v819_v12 = vld [vmem:[%s2429_s9 + $0x78] sm:$0xff] }
 0x1cc   :  { %v1879_v35 = vpop.eup %1878  ;;  %1496 = vmatprep.mubr.f32.mxu0 %v1877_v31 }
 0x1cd   :  { %1888 = vtanh.f32 %v306_v34  ;;  %1497 = vmatmul.mubr.f32.vlgmr.msra.gmra.mrb[8].mxu0 %v1879_v35 }
 0x1ce   :  { %1890 = vtanh.f32 %v311_v29  ;;  %1779 = vmatpush3.bf16.msra.mxu0 %v1776_v48 }
 0x1cf   :  { %v1881_v36 = vpop.eup %1880  ;;  %1781 = vmatprep.subr.bf16.mxu0 %v1780_v50 }
 0x1d0   :  { %v1883_v39 = vpop.eup %1882  ;;  %1499 = vmatprep.mubr.f32.mxu0 %v1881_v36 }
 0x1d1   :  { %1500 = vmatmul.mubr.f32.gmra.mrb[10].mxu0 %v1883_v39 }
 0x1d2   :  { %1783 = vmatpush3.bf16.msra.mxu0 %v1780_v50 }
 0x1d3   :  { %v1885_v40 = vpop.eup %1884  ;;  %1785 = vmatprep.subr.bf16.mxu0 %v1784_v53 }
 0x1d4   :  { %v1887_v41 = vpop.eup %1886  ;;  %1502 = vmatprep.mubr.f32.mxu0 %v1885_v40 }
 0x1d5   :  { %1503 = vmatmul.mubr.f32.gmra.mrb[12].mxu0 %v1887_v41 }
 0x1d6   :  { %1787 = vmatpush3.bf16.msra.mxu0 %v1784_v53 }
 0x1d7   :  { %v1889_v43 = vpop.eup %1888  ;;  %1789 = vmatprep.subr.bf16.mxu0 %v1788_v56 }
 0x1d8   :  { %v1891_v44 = vpop.eup %1890  ;;  %1505 = vmatprep.mubr.f32.mxu0 %v1889_v43 }
 0x1d9   :  { %1506 = vmatmul.mubr.f32.gmra.mrb[14].mxu0 %v1891_v44 }
 0x1da   :  { %1791 = vmatpush3.bf16.msra.mxu0 %v1788_v56 }
 0x1db   :  { %1793 = vmatprep.subr.bf16.mxu0 %v1792_v7 }
 0x1de   :  { %1795 = vmatpush3.bf16.msra.mxu0 %v1792_v7  ;;  %v811_v7 = vld [vmem:[%s2429_s9 + $0x38] sm:$0xff] }
 0x2a0   :  { %v1498_v57 = vpop.f32.mrb[8].mxu0 }
 0x2a1   :  { %v404_v58 = vpop.f32.mrb[9].mxu0 }
 0x2a2   :  { %v1760_v59 = vpack.c.bf16 %v1498_v57, %v404_v58  ;;  %v804_v58 = vld [vmem:[%s2429_s9] sm:$0xff] }
 0x2a4   :  { %v1501_v60 = vpop.f32.mrb[10].mxu0  ;;  %1761 = vmatprep.subr.bf16.mxu1 %v1760_v59 }
 0x2a5   :  { %v414_v61 = vpop.f32.mrb[11].mxu0  ;;  %1763 = vmatpush3.bf16.msra.mxu1 %v1760_v59  ;;  %v805_v59 = vld [vmem:[%s2429_s9 + $0x8] sm:$0xff] }
 0x2a6   :  { %v1764_v62 = vpack.c.bf16 %v1501_v60, %v414_v61 }
 0x2a8   :  { %v1504_v63 = vpop.f32.mrb[12].mxu0  ;;  %1765 = vmatprep.subr.bf16.mxu1 %v1764_v62 }
 0x2a9   :  { %v424_v0 = vpop.f32.mrb[13].mxu0  ;;  %1767 = vmatpush3.bf16.msra.mxu1 %v1764_v62 }
 0x2aa   :  { %v1768_v1 = vpack.c.bf16 %v1504_v63, %v424_v0  ;;  %v1824_v63 = vpack.c.bf16 %v805_v59, %v804_v58  ;;  %v806_v0 = vld [vmem:[%s2429_s9 + $0x10] sm:$0xff] }
 0x2ac   :  { %v1507_v2 = vpop.f32.mrb[14].mxu0  ;;  %1769 = vmatprep.subr.bf16.mxu1 %v1768_v1 }
 0x2ad   :  { %v434_v3 = vpop.f32.mrb[15].mxu0  ;;  %1771 = vmatpush3.bf16.msra.mxu1 %v1768_v1  ;;  %v807_v1 = vld [vmem:[%s2429_s9 + $0x18] sm:$0xff] }
 0x2ae   :  { %v1772_v4 = vpack.c.bf16 %v1507_v2, %v434_v3  ;;  %v1828_v2 = vpack.c.bf16 %v807_v1, %v806_v0  ;;  %v808_v3 = vld [vmem:[%s2429_s9 + $0x20] sm:$0xff]  ;;  %v930_v0 = vld [vmem:[%s2431_s1 + $0x28] sm:$0xff]  ;;  %v931_v1 = vld [vmem:[%s2431_s1 + $0x30] sm:$0xff] }
 0x2b0   :  { %1773 = vmatprep.subr.bf16.mxu1 %v1772_v4 }
 0x2b1   :  { %1775 = vmatpush3.bf16.msra.mxu1 %v1772_v4  ;;  %v809_v4 = vld [vmem:[%s2429_s9 + $0x28] sm:$0xff] }
 0x2b2   :  { %v1832_v5 = vpack.c.bf16 %v809_v4, %v808_v3  ;;  %v1941_v3 = vmov 0  }
 0x2b3   :  { %1874 = vset.pattern.permute.xlu1 %v1941_v3  ;;  %1875 = vset.pattern.permute.xlu0 %v1941_v3 }
 0x2b4   :  { %1525 = vmatmul.mubr.msk.f32.vlgmr.msra.gmra.mrb[8].mxu1 %vm56_vm0, %v2066_v27 }
 0x2b5   :  { %1527 = vmatprep.mubr.msk.f32.mxu1 %vm56_vm0, %v2071_v28 }
 0x2b8   :  { %1528 = vmatmul.mubr.msk.f32.gmra.mrb[10].mxu1 %vm56_vm0, %v2086_v32 }
 0x2b9   :  { %1530 = vmatprep.mubr.msk.f32.mxu1 %vm56_vm0, %v2091_v33 }
 0x2bc   :  { %1531 = vmatmul.mubr.msk.f32.gmra.mrb[12].mxu1 %vm56_vm0, %v2106_v37 }
 0x2bd   :  { %1533 = vmatprep.mubr.msk.f32.mxu1 %vm56_vm0, %v2111_v38 }
 0x2c0   :  { %1534 = vmatmul.mubr.msk.f32.gmra.mrb[14].mxu1 %vm56_vm0, %v2126_v42 }
 0x2c1   :  { %1596 = vmatprep.mubr.msk.f32.mxu1 %vm56_vm0, %v2023_v8  ;;  %v1796_v8 = vpack.c.bf16 %v574_v10, %v573_v9  ;;  %v816_v9 = vld [vmem:[%s2429_s9 + $0x60] sm:$0xff]  ;;  %v817_v10 = vld [vmem:[%s2429_s9 + $0x68] sm:$0xff] }
 0x2c3   :  { %1797 = vmatprep.subr.bf16.mxu0 %v1796_v8 }
 0x2c4   :  { %1799 = vmatpush3.bf16.msra.mxu0 %v1796_v8  ;;  %v1848_v8 = vpack.c.bf16 %v817_v10, %v816_v9 }
 0x2c5   :  { %1801 = vmatprep.subr.bf16.mxu0 %v1800_v13 }
 0x2c8   :  { %1803 = vmatpush3.bf16.msra.mxu0 %v1800_v13  ;;  %v1852_v13 = vpack.c.bf16 %v819_v12, %v818_v11 }
 0x2c9   :  { %1805 = vmatprep.subr.bf16.mxu0 %v1804_v16 }
 0x2cc   :  { %1807 = vmatpush3.bf16.msra.mxu0 %v1804_v16 }
 0x387   :  { %v1526_v18 = vpop.f32.mrb[8].mxu1 }
 0x388   :  { %v522_v19 = vadd.f32 %v1526_v18, %v1205_v17  ;;  %v516_v20 = vpop.f32.mrb[9].mxu1 }
 0x389   :  { %v517_v21 = vadd.f32 %v1205_v17, %v516_v20 }
 0x38b   :  { %1892 = vtanh.f32 %v517_v21  ;;  %v1529_v22 = vpop.f32.mrb[10].mxu1 }
 0x38c   :  { %1894 = vtanh.f32 %v522_v19  ;;  %v532_v23 = vadd.f32 %v1529_v22, %v1205_v17  ;;  %v526_v24 = vpop.f32.mrb[11].mxu1 }
 0x38d   :  { %v527_v25 = vadd.f32 %v1205_v17, %v526_v24 }
 0x38f   :  { %1896 = vtanh.f32 %v527_v25  ;;  %v1532_v26 = vpop.f32.mrb[12].mxu1 }
 0x390   :  { %1898 = vtanh.f32 %v532_v23  ;;  %v542_v29 = vadd.f32 %v1532_v26, %v1205_v17  ;;  %v536_v30 = vpop.f32.mrb[13].mxu1 }
 0x391   :  { %v537_v31 = vadd.f32 %v1205_v17, %v536_v30 }
 0x393   :  { %1900 = vtanh.f32 %v537_v31  ;;  %v1535_v34 = vpop.f32.mrb[14].mxu1 }
 0x394   :  { %1902 = vtanh.f32 %v542_v29  ;;  %v552_v35 = vadd.f32 %v1535_v34, %v1205_v17  ;;  %v546_v36 = vpop.f32.mrb[15].mxu1 }
 0x395   :  { %v1893_v39 = vpop.eup %1892  ;;  %v547_v40 = vadd.f32 %v1205_v17, %v546_v36 }
 0x396   :  { %v1895_v41 = vpop.eup %1894  ;;  %1568 = vmatprep.mubr.f32.mxu0 %v1893_v39 }
 0x397   :  { %1904 = vtanh.f32 %v547_v40  ;;  %1569 = vmatmul.mubr.f32.vlgmr.msra.gmra.mrb[16].mxu0 %v1895_v41 }
 0x398   :  { %1906 = vtanh.f32 %v552_v35 }
 0x399   :  { %v1897_v43 = vpop.eup %1896 }
 0x39a   :  { %v1899_v44 = vpop.eup %1898  ;;  %1571 = vmatprep.mubr.f32.mxu0 %v1897_v43 }
 0x39b   :  { %1572 = vmatmul.mubr.f32.gmra.mrb[18].mxu0 %v1899_v44 }
 0x39d   :  { %v1901_v45 = vpop.eup %1900 }
 0x39e   :  { %v1903_v46 = vpop.eup %1902  ;;  %1574 = vmatprep.mubr.f32.mxu0 %v1901_v45 }
 0x39f   :  { %1575 = vmatmul.mubr.f32.gmra.mrb[20].mxu0 %v1903_v46  ;;  %v925_v46 = vld [vmem:[%s2431_s1] sm:$0xff] }
 0x3a1   :  { %v1905_v47 = vpop.eup %1904 }
 0x3a2   :  { %v1907_v48 = vpop.eup %1906  ;;  %1577 = vmatprep.mubr.f32.mxu0 %v1905_v47 }
 0x3a3   :  { %1578 = vmatmul.mubr.f32.gmra.mrb[22].mxu0 %v1907_v48 }
 0x3a4   :  { %1668 = vmatprep.mubr.msk.f32.mxu0 %vm56_vm0, %v925_v46 }
 0x46a   :  { %v1570_v49 = vpop.f32.mrb[16].mxu0 }
 0x46b   :  { %v645_v50 = vpop.f32.mrb[17].mxu0 }
 0x46c   :  { %v1808_v51 = vpack.c.bf16 %v1570_v49, %v645_v50 }
 0x46e   :  { %v1573_v52 = vpop.f32.mrb[18].mxu0  ;;  %1809 = vmatprep.subr.bf16.mxu1 %v1808_v51 }
 0x46f   :  { %v655_v53 = vpop.f32.mrb[19].mxu0  ;;  %1811 = vmatpush3.bf16.msra.mxu1 %v1808_v51 }
 0x470   :  { %v1812_v54 = vpack.c.bf16 %v1573_v52, %v655_v53  ;;  %v16_v52 = vstv %s2432_s10 }
 0x471   :  { %17 = vst [vmem:[#allocation2] sm:$0x1] %v16_v52 }
 0x472   :  { %v1576_v55 = vpop.f32.mrb[20].mxu0  ;;  %1813 = vmatprep.subr.bf16.mxu1 %v1812_v54 }
 0x473   :  { %v665_v56 = vpop.f32.mrb[21].mxu0  ;;  %1815 = vmatpush3.bf16.msra.mxu1 %v1812_v54 }
 0x474   :  { %v1816_v57 = vpack.c.bf16 %v1576_v55, %v665_v56 }
 0x476   :  { %v1579_v60 = vpop.f32.mrb[22].mxu0  ;;  %1817 = vmatprep.subr.bf16.mxu1 %v1816_v57 }
 0x477   :  { %v675_v61 = vpop.f32.mrb[23].mxu0  ;;  %1819 = vmatpush3.bf16.msra.mxu1 %v1816_v57 }
 0x478   :  { %v1820_v62 = vpack.c.bf16 %v1579_v60, %v675_v61  ;;  %v926_v60 = vld [vmem:[%s2431_s1 + $0x8] sm:$0xff]  ;;  %v927_v61 = vld [vmem:[%s2431_s1 + $0x10] sm:$0xff] }
 0x47a   :  { %1821 = vmatprep.subr.bf16.mxu1 %v1820_v62 }
 0x47b   :  { %1823 = vmatpush3.bf16.msra.mxu1 %v1820_v62  ;;  %v928_v62 = vld [vmem:[%s2431_s1 + $0x18] sm:$0xff] }
 0x47c   :  { %1825 = vmatprep.subr.bf16.mxu1 %v1824_v63 }
 0x47e   :  { %1597 = vmatmul.mubr.msk.f32.vlgmr.msra.gmra.mrb[16].mxu1 %vm56_vm0, %v2066_v27  ;;  %v1836_v27 = vpack.c.bf16 %v811_v7, %v810_v6 }
 0x47f   :  { %1599 = vmatprep.mubr.msk.f32.mxu1 %vm56_vm0, %v2071_v28  ;;  %1827 = vmatpush3.bf16.msra.mxu1 %v1824_v63  ;;  %v812_v28 = vld [vmem:[%s2429_s9 + $0x40] sm:$0xff] }
 0x480   :  { %1829 = vmatprep.subr.bf16.mxu1 %v1828_v2  ;;  %v929_v63 = vld [vmem:[%s2431_s1 + $0x20] sm:$0xff] }
 0x482   :  { %1600 = vmatmul.mubr.msk.f32.gmra.mrb[18].mxu1 %vm56_vm0, %v2086_v32  ;;  %v813_v32 = vld [vmem:[%s2429_s9 + $0x48] sm:$0xff] }
 0x483   :  { %1602 = vmatprep.mubr.msk.f32.mxu1 %vm56_vm0, %v2091_v33  ;;  %1831 = vmatpush3.bf16.msra.mxu1 %v1828_v2  ;;  %v1840_v33 = vpack.c.bf16 %v813_v32, %v812_v28  ;;  %v932_v2 = vld [vmem:[%s2431_s1 + $0x38] sm:$0xff] }
 0x484   :  { %1833 = vmatprep.subr.bf16.mxu1 %v1832_v5 }
 0x486   :  { %1603 = vmatmul.mubr.msk.f32.gmra.mrb[20].mxu1 %vm56_vm0, %v2106_v37  ;;  %v814_v37 = vld [vmem:[%s2429_s9 + $0x50] sm:$0xff] }
 0x487   :  { %1605 = vmatprep.mubr.msk.f32.mxu1 %vm56_vm0, %v2111_v38  ;;  %1835 = vmatpush3.bf16.msra.mxu1 %v1832_v5  ;;  %v815_v38 = vld [vmem:[%s2429_s9 + $0x58] sm:$0xff] }
 0x488   :  { %1837 = vmatprep.subr.bf16.mxu1 %v1836_v27 }
 0x48a   :  { %1606 = vmatmul.mubr.msk.f32.gmra.mrb[22].mxu1 %vm56_vm0, %v2126_v42  ;;  %v1844_v42 = vpack.c.bf16 %v815_v38, %v814_v37 }
 0x48b   :  { %1839 = vmatpush3.bf16.msra.mxu1 %v1836_v27  ;;  %v1231_v27 = vld [vmem:[#allocation2] ss:$0 sm:$0xff] }
 0x48c   :  { %1841 = vmatprep.subr.bf16.mxu1 %v1840_v33 }
 0x48f   :  { %1843 = vmatpush3.bf16.msra.mxu1 %v1840_v33 }
 0x490   :  { %1845 = vmatprep.subr.bf16.mxu1 %v1844_v42 }
 0x493   :  { %1847 = vmatpush3.bf16.msra.mxu1 %v1844_v42 }
 0x494   :  { %1849 = vmatprep.subr.bf16.mxu1 %v1848_v8 }
 0x497   :  { %1851 = vmatpush3.bf16.msra.mxu1 %v1848_v8 }
 0x498   :  { %1853 = vmatprep.subr.bf16.mxu1 %v1852_v13 }
 0x49b   :  { %1855 = vmatpush3.bf16.msra.mxu1 %v1852_v13 }
 0x551   :  { %v1598_v15 = vpop.f32.mrb[16].mxu1 }
 0x552   :  { %v763_v16 = vadd.f32 %v1598_v15, %v1214_v14  ;;  %v757_v17 = vpop.f32.mrb[17].mxu1 }
 0x553   :  { %v758_v18 = vadd.f32 %v1214_v14, %v757_v17 }
 0x555   :  { %1908 = vtanh.f32 %v758_v18  ;;  %v1601_v19 = vpop.f32.mrb[18].mxu1 }
 0x556   :  { %1910 = vtanh.f32 %v763_v16  ;;  %v773_v20 = vadd.f32 %v1601_v19, %v1214_v14  ;;  %v767_v21 = vpop.f32.mrb[19].mxu1 }
 0x557   :  { %v768_v22 = vadd.f32 %v1214_v14, %v767_v21 }
 0x559   :  { %1912 = vtanh.f32 %v768_v22  ;;  %v1604_v23 = vpop.f32.mrb[20].mxu1 }
 0x55a   :  { %1914 = vtanh.f32 %v773_v20  ;;  %v783_v24 = vadd.f32 %v1604_v23, %v1214_v14  ;;  %v777_v25 = vpop.f32.mrb[21].mxu1 }
 0x55b   :  { %v778_v26 = vadd.f32 %v1214_v14, %v777_v25 }
 0x55d   :  { %1916 = vtanh.f32 %v778_v26  ;;  %v1607_v29 = vpop.f32.mrb[22].mxu1 }
 0x55e   :  { %1918 = vtanh.f32 %v783_v24  ;;  %v793_v30 = vadd.f32 %v1607_v29, %v1214_v14  ;;  %v787_v31 = vpop.f32.mrb[23].mxu1 }
 0x55f   :  { %v2315_v34 = vpop.eup %1908  ;;  %v788_v35 = vadd.f32 %v1214_v14, %v787_v31 }
 0x560   :  { %v2317_v36 = vpop.eup %1910  ;;  %1640 = vmatprep.mubr.f32.mxu1 %v2315_v34 }
 0x561   :  { %1920 = vtanh.f32 %v788_v35  ;;  %1641 = vmatmul.mubr.f32.vlgmr.msra.gmra.mrb[24].mxu1 %v2317_v36 }
 0x562   :  { %1922 = vtanh.f32 %v793_v30 }
 0x563   :  { %v2321_v39 = vpop.eup %1912 }
 0x564   :  { %v2323_v40 = vpop.eup %1914  ;;  %1643 = vmatprep.mubr.f32.mxu1 %v2321_v39 }
 0x565   :  { %1644 = vmatmul.mubr.f32.gmra.mrb[26].mxu1 %v2323_v40 }
 0x567   :  { %v2327_v41 = vpop.eup %1916 }
 0x568   :  { %v2329_v43 = vpop.eup %1918  ;;  %1646 = vmatprep.mubr.f32.mxu1 %v2327_v41 }
 0x569   :  { %1647 = vmatmul.mubr.f32.gmra.mrb[28].mxu1 %v2329_v43 }
 0x56b   :  { %v2333_v44 = vpop.eup %1920 }
 0x56c   :  { %v2335_v45 = vpop.eup %1922  ;;  %1649 = vmatprep.mubr.f32.mxu1 %v2333_v44 }
 0x56d   :  { %1650 = vmatmul.mubr.f32.gmra.mrb[30].mxu1 %v2335_v45 }
 0x634   :  { %v1642_v47 = vpop.f32.mrb[24].mxu1 }
 0x635   :  { %1072 = vrot.lane.b32.xlu0 %v1642_v47, %s1940_s25  ;;  %v886_v48 = vpop.f32.mrb[25].mxu1 }
 0x636   :  { %v1856_v49 = vpack.c.bf16 %v1642_v47, %v886_v48 }
 0x638   :  { %v1645_v50 = vpop.f32.mrb[26].mxu1  ;;  %1857 = vmatprep.subr.bf16.mxu0 %v1856_v49 }
 0x639   :  { %1070 = vrot.lane.b32.xlu0 %v886_v48, %s1940_s25  ;;  %1859 = vmatpush3.bf16.msra.mxu0 %v1856_v49  ;;  %v896_v51 = vpop.f32.mrb[27].mxu1 }
 0x63a   :  { %1076 = vrot.lane.b32.xlu1 %v1645_v50, %s1940_s25  ;;  %v1860_v53 = vpack.c.bf16 %v1645_v50, %v896_v51 }
 0x63c   :  { %v1648_v54 = vpop.f32.mrb[28].mxu1  ;;  %1861 = vmatprep.subr.bf16.mxu0 %v1860_v53 }
 0x63d   :  { %v906_v55 = vpop.f32.mrb[29].mxu1  ;;  %1863 = vmatpush3.bf16.msra.mxu0 %v1860_v53  ;;  %v1125_v53 = vlaneseq }
 0x63e   :  { %1074 = vrot.lane.b32.xlu1 %v896_v51, %s1940_s25  ;;  %v1864_v56 = vpack.c.bf16 %v1648_v54, %v906_v55  ;;  %1078 = vrot.lane.b32.xlu0 %v906_v55, %s1940_s25 }
 0x640   :  { %v1651_v57 = vpop.f32.mrb[30].mxu1  ;;  %1865 = vmatprep.subr.bf16.mxu0 %v1864_v56 }
 0x641   :  { %v916_v58 = vpop.f32.mrb[31].mxu1  ;;  %1867 = vmatpush3.bf16.msra.mxu0 %v1864_v56 }
 0x642   :  { %1080 = vrot.lane.b32.xlu1 %v1648_v54, %s1940_s25  ;;  %v1868_v59 = vpack.c.bf16 %v1651_v57, %v916_v58  ;;  %1082 = vrot.lane.b32.xlu0 %v916_v58, %s1940_s25  ;;  %v1126_v54 = vand.u32 127, %v1125_v53 }
 0x644   :  { %1869 = vmatprep.subr.bf16.mxu0 %v1868_v59  ;;  %vm1127_vm1 = vcmp.eq.s32.totalorder %v1126_v54, 32 }
 0x645   :  { %1871 = vmatpush3.bf16.msra.mxu0 %v1868_v59 }
 0x646   :  { %1084 = vrot.lane.b32.xlu1 %v1651_v57, %s1940_s25 }
 0x648   :  { %1669 = vmatmul.mubr.msk.f32.vlgmr.msra.gmra.mrb[24].mxu0 %vm56_vm0, %v926_v60 }
 0x649   :  { %1671 = vmatprep.mubr.msk.f32.mxu0 %vm56_vm0, %v927_v61 }
 0x64c   :  { %1672 = vmatmul.mubr.msk.f32.gmra.mrb[26].mxu0 %vm56_vm0, %v928_v62 }
 0x64d   :  { %1674 = vmatprep.mubr.msk.f32.mxu0 %vm56_vm0, %v929_v63 }
 0x650   :  { %1675 = vmatmul.mubr.msk.f32.gmra.mrb[28].mxu0 %vm56_vm0, %v930_v0 }
 0x651   :  { %1677 = vmatprep.mubr.msk.f32.mxu0 %vm56_vm0, %v931_v1 }
 0x654   :  { %1678 = vmatmul.mubr.msk.f32.gmra.mrb[30].mxu0 %vm56_vm0, %v932_v2 }
 0x6a7   :  { %v1073_v5 = vpop.permute.xlu0 %1072 }
 0x6ab   :  { %v1071_v28 = vpop.permute.xlu0 %1070 }
 0x6ac   :  { %v1077_v4 = vpop.permute.xlu1 %1076 }
 0x6b0   :  { %v1075_v6 = vpop.permute.xlu1 %1074  ;;  %v1079_v13 = vpop.permute.xlu0 %1078 }
 0x6b4   :  { %v1081_v11 = vpop.permute.xlu1 %1080  ;;  %v1083_v24 = vpop.permute.xlu0 %1082 }
 0x6b8   :  { %v1085_v21 = vpop.permute.xlu1 %1084 }
 0x71b   :  { %v1670_v7 = vpop.f32.mrb[24].mxu0 }
 0x71c   :  { %v1095_v32 = vadd.f32 %v1670_v7, %v1073_v5  ;;  %v1023_v33 = vpop.f32.mrb[25].mxu0 }
 0x71d   :  { %v1094_v37 = vadd.f32 %v1071_v28, %v1023_v33 }
 0x71e   :  { %v1110_v38 = vadd.f32 %v1231_v27, %v1095_v32 }
 0x71f   :  { %v1109_v42 = vadd.f32 %v1231_v27, %v1094_v37  ;;  %v1673_v9 = vpop.f32.mrb[26].mxu0 }
 0x720   :  { %1924 = vtanh.f32 %v1110_v38  ;;  %v1097_v10 = vadd.f32 %v1673_v9, %v1077_v4  ;;  %v1033_v8 = vpop.f32.mrb[27].mxu0 }
 0x721   :  { %1926 = vtanh.f32 %v1109_v42  ;;  %v1096_v12 = vadd.f32 %v1075_v6, %v1033_v8 }
 0x722   :  { %v1112_v14 = vadd.f32 %v1231_v27, %v1097_v10 }
 0x723   :  { %v1111_v15 = vadd.f32 %v1231_v27, %v1096_v12  ;;  %v1676_v16 = vpop.f32.mrb[28].mxu0 }
 0x724   :  { %1928 = vtanh.f32 %v1112_v14  ;;  %v1099_v17 = vadd.f32 %v1676_v16, %v1081_v11  ;;  %v1043_v18 = vpop.f32.mrb[29].mxu0 }
 0x725   :  { %1930 = vtanh.f32 %v1111_v15  ;;  %v1098_v19 = vadd.f32 %v1079_v13, %v1043_v18 }
 0x726   :  { %v1114_v20 = vadd.f32 %v1231_v27, %v1099_v17 }
 0x727   :  { %v1113_v22 = vadd.f32 %v1231_v27, %v1098_v19  ;;  %v1679_v23 = vpop.f32.mrb[30].mxu0 }
 0x728   :  { %1932 = vtanh.f32 %v1114_v20  ;;  %v1101_v25 = vadd.f32 %v1679_v23, %v1085_v21  ;;  %v1053_v26 = vpop.f32.mrb[31].mxu0 }
 0x729   :  { %1934 = vtanh.f32 %v1113_v22  ;;  %v1100_v29 = vadd.f32 %v1083_v24, %v1053_v26 }
 0x72a   :  { %v1925_v30 = vpop.eup %1924  ;;  %v1116_v31 = vadd.f32 %v1231_v27, %v1101_v25 }
 0x72b   :  { %v1927_v35 = vpop.eup %1926  ;;  %v1115_v46 = vadd.f32 %v1231_v27, %v1100_v29  ;;  %1135 = vperm.xlu1 %1874, %v1925_v30  }
 0x72c   :  { %1936 = vtanh.f32 %v1116_v31  ;;  %1130 = vperm.xlu0 %1875, %v1927_v35  }
 0x72d   :  { %1938 = vtanh.f32 %v1115_v46 }
 0x72e   :  { %v1929_v47 = vpop.eup %1928 }
 0x72f   :  { %v1931_v48 = vpop.eup %1930 }
 0x730   :  { %1145 = vperm.xlu0 %1875, %v1929_v47   ;;  %1140 = vperm.xlu1 %1874, %v1931_v48  }
 0x732   :  { %v1933_v49 = vpop.eup %1932 }
 0x733   :  { %v1935_v50 = vpop.eup %1934 }
 0x734   :  { %1155 = vperm.xlu0 %1875, %v1933_v49   ;;  %1150 = vperm.xlu1 %1874, %v1935_v50  }
 0x736   :  { %v1937_v51 = vpop.eup %1936 }
 0x737   :  { %v1939_v52 = vpop.eup %1938 }
 0x738   :  { %1165 = vperm.xlu0 %1875, %v1937_v51   ;;  %1160 = vperm.xlu1 %1874, %v1939_v52  }
 0x7aa   :  { %v1136_v55 = vpop.permute.xlu1 %1135 }
 0x7ab   :  { %v1169_v56 = vsel %vm1127_vm1, %v1136_v55, 0.0  ;;  %v1131_v57 = vpop.permute.xlu0 %1130 }
 0x7ac   :  { %v1177_v58 = vadd.f32 %v2317_v36, %v1169_v56  ;;  %v1168_v59 = vsel %vm1127_vm1, %v1131_v57, 0.0 }
 0x7ad   :  { %v1176_v60 = vadd.f32 %v2315_v34, %v1168_v59 }
 0x7ae   :  { %1185 = vst [vmem:[%s2433_s11 + $0x8] sm:$0xff] %v1177_v58 }
 0x7af   :  { %1184 = vst [vmem:[%s2433_s11] sm:$0xff] %v1176_v60  ;;  %v1146_v61 = vpop.permute.xlu0 %1145  ;;  %v1141_v62 = vpop.permute.xlu1 %1140 }
 0x7b0   :  { %v1171_v63 = vsel %vm1127_vm1, %v1146_v61, 0.0  ;;  %v1170_v0 = vsel %vm1127_vm1, %v1141_v62, 0.0 }
 0x7b1   :  { %v1179_v36 = vadd.f32 %v2323_v40, %v1171_v63  ;;  %v1178_v1 = vadd.f32 %v2321_v39, %v1170_v0 }
 0x7b3   :  { %1187 = vst [vmem:[%s2433_s11 + $0x18] sm:$0xff] %v1179_v36  ;;  %1186 = vst [vmem:[%s2433_s11 + $0x10] sm:$0xff] %v1178_v1  ;;  %v1156_v34 = vpop.permute.xlu0 %1155  ;;  %v1151_v2 = vpop.permute.xlu1 %1150 }
 0x7b4   :  { %v1173_v3 = vsel %vm1127_vm1, %v1156_v34, 0.0  ;;  %v1172_v4 = vsel %vm1127_vm1, %v1151_v2, 0.0 }
 0x7b5   :  { %v1181_v5 = vadd.f32 %v2329_v43, %v1173_v3  ;;  %v1180_v40 = vadd.f32 %v2327_v41, %v1172_v4 }
 0x7b7   :  { %1189 = vst [vmem:[%s2433_s11 + $0x28] sm:$0xff] %v1181_v5  ;;  %1188 = vst [vmem:[%s2433_s11 + $0x20] sm:$0xff] %v1180_v40  ;;  %v1166_v39 = vpop.permute.xlu0 %1165  ;;  %v1161_v6 = vpop.permute.xlu1 %1160 }
 0x7b8   :  { %v1175_v7 = vsel %vm1127_vm1, %v1166_v39, 0.0  ;;  %v1174_v27 = vsel %vm1127_vm1, %v1161_v6, 0.0 }
 0x7b9   :  { %v1183_v28 = vadd.f32 %v2335_v45, %v1175_v7  ;;  %v1182_v43 = vadd.f32 %v2333_v44, %v1174_v27 }
 0x7bb   :  { %1191 = vst [vmem:[%s2433_s11 + $0x38] sm:$0xff] %v1183_v28  ;;  %1190 = vst [vmem:[%s2433_s11 + $0x30] sm:$0xff] %v1182_v43 }

// kernel: gcn_forward.3
= control target key start
LH: loop header
LB: loop body
LE: loop exit
PB: predicated region body
PF: predicated region fallthrough
CT: control target
= control target key end

     0   :  { %v821_v0 = vmov 0.0|0.0   ;;  %vm822_vm0 = vmmov 0   ;;  %v823_v4 = vmov 0.0   ;;  %vm129_vm1 = vcmask 64512   ;;  %s1087_s3 = inlined_call_operand.vmem [shape: f32[128,128], index: 3, kind: input, shape index: {}]   ;;  %s1088_s2 = inlined_call_operand.vmem [shape: f32[8,128], index: 2, kind: input, shape index: {}]   ;;  %s1089_s5 = inlined_call_operand.vmem [shape: f32[128,128], index: 5, kind: input, shape index: {}]   ;;  %s1090_s0 = inlined_call_operand.vmem [shape: f32[8,8], index: 0, kind: input, shape index: {}]   ;;  %s1091_s4 = inlined_call_operand.vmem [shape: f32[1,128], index: 4, kind: input, shape index: {}]   ;;  %s1092_s7 = inlined_call_operand.vmem [shape: f32[128,2], index: 7, kind: input, shape index: {}]   ;;  %s1093_s6 = inlined_call_operand.vmem [shape: f32[1,128], index: 6, kind: input, shape index: {}]   ;;  %s1094_s8 = inlined_call_operand.<no memory space> [shape: f32[1,1], index: 8, kind: input, shape index: {}]   ;;  %s1095_s1 = inlined_call_operand.vmem [shape: f32[8,8], index: 1, kind: input, shape index: {}]   ;;  %s1096_s9 = inlined_call_operand.vmem [shape: f32[8,128], index: 9, kind: output, shape index: {}]  }
   0x1   :  { %739 = vmatprep.subr.bf16.mxu0 %v821_v0  ;;  %v36_v1 = vld [vmem:[%s1087_s3] sm:$0xff]  ;;  %v37_v2 = vld [vmem:[%s1087_s3 + $0x8] sm:$0xff]  ;;  %v38_v3 = vld [vmem:[%s1087_s3 + $0x10] sm:$0xff]  ;;  %651 = vmatprep.mubr.msk.f32.mxu0 %vm822_vm0, %v823_v4 }
   0x2   :  { %v740_v5 = vpack.c.bf16 %v37_v2, %v36_v1  ;;  %v39_v6 = vld [vmem:[%s1087_s3 + $0x18] sm:$0xff]  ;;  %763 = vmatprep.subr.bf16.mxu1 %v821_v0  ;;  %691 = vmatprep.mubr.msk.f32.mxu1 %vm822_vm0, %v823_v4  ;;  %v40_v8 = vld [vmem:[%s1087_s3 + $0x20] sm:$0xff]  ;;  %v41_v9 = vld [vmem:[%s1087_s3 + $0x28] sm:$0xff] }
   0x3   :  { %v743_v7 = vpack.c.bf16 %v39_v6, %v38_v3  ;;  %v746_v10 = vpack.c.bf16 %v41_v9, %v40_v8  ;;  %v42_v11 = vld [vmem:[%s1087_s3 + $0x30] sm:$0xff]  ;;  %v43_v12 = vld [vmem:[%s1087_s3 + $0x38] sm:$0xff]  ;;  %v44_v14 = vld [vmem:[%s1087_s3 + $0x40] sm:$0xff] }
   0x4   :  { %741 = vmatpush3.bf16.msra.mxu0 %v740_v5  ;;  %v749_v13 = vpack.c.bf16 %v43_v12, %v42_v11  ;;  %v45_v15 = vld [vmem:[%s1087_s3 + $0x48] sm:$0xff]  ;;  %v46_v17 = vld [vmem:[%s1087_s3 + $0x50] sm:$0xff]  ;;  %v47_v18 = vld [vmem:[%s1087_s3 + $0x58] sm:$0xff] }
   0x5   :  { %742 = vmatprep.subr.bf16.mxu0 %v821_v0  ;;  %v752_v16 = vpack.c.bf16 %v45_v15, %v44_v14  ;;  %v755_v19 = vpack.c.bf16 %v47_v18, %v46_v17  ;;  %v48_v20 = vld [vmem:[%s1087_s3 + $0x60] sm:$0xff]  ;;  %v49_v21 = vld [vmem:[%s1087_s3 + $0x68] sm:$0xff]  ;;  %v50_v23 = vld [vmem:[%s1087_s3 + $0x70] sm:$0xff] }
   0x6   :  { %v758_v22 = vpack.c.bf16 %v49_v21, %v48_v20  ;;  %v51_v24 = vld [vmem:[%s1087_s3 + $0x78] sm:$0xff]  ;;  %v35_v26 = vld [vmem:[%s1088_s2] sm:$0xff]  ;;  %v205_v28 = vld [vmem:[%s1089_s5 + $0x8] sm:$0xff] }
   0x7   :  { %v761_v25 = vpack.c.bf16 %v51_v24, %v50_v23  ;;  %v204_v27 = vld [vmem:[%s1089_s5] sm:$0xff]  ;;  %v206_v29 = vld [vmem:[%s1089_s5 + $0x10] sm:$0xff]  ;;  %v207_v31 = vld [vmem:[%s1089_s5 + $0x18] sm:$0xff] }
   0x8   :  { %744 = vmatpush3.bf16.msra.mxu0 %v743_v7  ;;  %v764_v30 = vpack.c.bf16 %v205_v28, %v204_v27  ;;  %v767_v32 = vpack.c.bf16 %v207_v31, %v206_v29  ;;  %v208_v33 = vld [vmem:[%s1089_s5 + $0x20] sm:$0xff]  ;;  %v209_v34 = vld [vmem:[%s1089_s5 + $0x28] sm:$0xff]  ;;  %v210_v36 = vld [vmem:[%s1089_s5 + $0x30] sm:$0xff]  ;;  %v825_v29 = vmov 0  }
   0x9   :  { %745 = vmatprep.subr.bf16.mxu0 %v821_v0  ;;  %v770_v35 = vpack.c.bf16 %v209_v34, %v208_v33  ;;  %v211_v37 = vld [vmem:[%s1089_s5 + $0x38] sm:$0xff]  ;;  %v212_v39 = vld [vmem:[%s1089_s5 + $0x40] sm:$0xff]  ;;  %v213_v40 = vld [vmem:[%s1089_s5 + $0x48] sm:$0xff]  ;;  %816 = vset.pattern.permute.xlu0 %v825_v29 }
   0xa   :  { %765 = vmatpush3.bf16.msra.mxu1 %v764_v30  ;;  %v773_v38 = vpack.c.bf16 %v211_v37, %v210_v36  ;;  %v776_v41 = vpack.c.bf16 %v213_v40, %v212_v39  ;;  %v981_v42 = vld [vmem:[%s1090_s0] sm:$0xff]  ;;  %v214_v45 = vld [vmem:[%s1089_s5 + $0x50] sm:$0xff]  ;;  %v215_v46 = vld [vmem:[%s1089_s5 + $0x58] sm:$0xff]  ;;  %v541_v37 = vlaneseq }
   0xb   :  { %766 = vmatprep.subr.bf16.mxu1 %v821_v0  ;;  %v779_v47 = vpack.c.bf16 %v215_v46, %v214_v45  ;;  %v216_v48 = vld [vmem:[%s1089_s5 + $0x60] sm:$0xff]  ;;  %v217_v49 = vld [vmem:[%s1089_s5 + $0x68] sm:$0xff]  ;;  %v218_v51 = vld [vmem:[%s1089_s5 + $0x70] sm:$0xff] }
   0xc   :  { %747 = vmatpush3.bf16.msra.mxu0 %v746_v10  ;;  %v782_v50 = vpack.c.bf16 %v217_v49, %v216_v48  ;;  %v219_v52 = vld [vmem:[%s1089_s5 + $0x78] sm:$0xff]  ;;  %v556_v54 = vld [vmem:[%s1091_s4] ss:$0 sm:$0xff]  ;;  %v368_v60 = vld [vmem:[%s1092_s7 + $0x8] sm:$0xff] }
   0xd   :  { %748 = vmatprep.subr.bf16.mxu0 %v821_v0  ;;  %v785_v53 = vpack.c.bf16 %v219_v52, %v218_v51  ;;  %v367_v59 = vld [vmem:[%s1092_s7] sm:$0xff]  ;;  %v369_v61 = vld [vmem:[%s1092_s7 + $0x10] sm:$0xff]  ;;  %v370_v63 = vld [vmem:[%s1092_s7 + $0x18] sm:$0xff] }
   0xe   :  { %768 = vmatpush3.bf16.msra.mxu1 %v767_v32  ;;  %v788_v62 = vpack.c.bf16 %v368_v60, %v367_v59  ;;  %v791_v1 = vpack.c.bf16 %v370_v63, %v369_v61  ;;  %v371_v2 = vld [vmem:[%s1092_s7 + $0x20] sm:$0xff]  ;;  %v372_v3 = vld [vmem:[%s1092_s7 + $0x28] sm:$0xff]  ;;  %v373_v6 = vld [vmem:[%s1092_s7 + $0x30] sm:$0xff] }
   0xf   :  { %769 = vmatprep.subr.bf16.mxu1 %v821_v0  ;;  %v794_v5 = vpack.c.bf16 %v372_v3, %v371_v2  ;;  %v374_v7 = vld [vmem:[%s1092_s7 + $0x38] sm:$0xff]  ;;  %v375_v9 = vld [vmem:[%s1092_s7 + $0x40] sm:$0xff]  ;;  %v376_v10 = vld [vmem:[%s1092_s7 + $0x48] sm:$0xff] }
  0x10   :  { %750 = vmatpush3.bf16.msra.mxu0 %v749_v13  ;;  %v797_v8 = vpack.c.bf16 %v374_v7, %v373_v6  ;;  %v800_v11 = vpack.c.bf16 %v376_v10, %v375_v9  ;;  %v377_v12 = vld [vmem:[%s1092_s7 + $0x50] sm:$0xff]  ;;  %v378_v13 = vld [vmem:[%s1092_s7 + $0x58] sm:$0xff]  ;;  %v379_v15 = vld [vmem:[%s1092_s7 + $0x60] sm:$0xff] }
  0x11   :  { %751 = vmatprep.subr.bf16.mxu0 %v821_v0  ;;  %v803_v14 = vpack.c.bf16 %v378_v13, %v377_v12  ;;  %v381_v20 = vld [vmem:[%s1092_s7 + $0x70] sm:$0xff]  ;;  %v382_v21 = vld [vmem:[%s1092_s7 + $0x78] sm:$0xff] }
  0x12   :  { %771 = vmatpush3.bf16.msra.mxu1 %v770_v35 }
  0x13   :  { %772 = vmatprep.subr.bf16.mxu1 %v821_v0 }
  0x14   :  { %753 = vmatpush3.bf16.msra.mxu0 %v752_v16  ;;  %v380_v16 = vld [vmem:[%s1092_s7 + $0x68] sm:$0xff]  ;;  %s824_s7 = smov 127  }
  0x15   :  { %754 = vmatprep.subr.bf16.mxu0 %v821_v0  ;;  %v806_v17 = vpack.c.bf16 %v380_v16, %v379_v15 }
  0x16   :  { %774 = vmatpush3.bf16.msra.mxu1 %v773_v38  ;;  %v542_v38 = vand.u32 127, %v541_v37 }
  0x17   :  { %775 = vmatprep.subr.bf16.mxu1 %v821_v0 }
  0x18   :  { %756 = vmatpush3.bf16.msra.mxu0 %v755_v19  ;;  %vm543_vm2 = vcmp.eq.s32.totalorder %v542_v38, 64 }
  0x19   :  { %757 = vmatprep.subr.bf16.mxu0 %v821_v0 }
  0x1a   :  { %777 = vmatpush3.bf16.msra.mxu1 %v776_v41 }
  0x1b   :  { %778 = vmatprep.subr.bf16.mxu1 %v821_v0 }
  0x1c   :  { %759 = vmatpush3.bf16.msra.mxu0 %v758_v22  ;;  %v558_v22 = vld [vmem:[%s1093_s6] ss:$0 sm:$0xff] }
  0x1d   :  { %760 = vmatprep.subr.bf16.mxu0 %v821_v0 }
  0x1e   :  { %780 = vmatpush3.bf16.msra.mxu1 %v779_v47 }
  0x1f   :  { %781 = vmatprep.subr.bf16.mxu1 %v821_v0 }
  0x20   :  { %762 = vmatpush3.bf16.msra.mxu0 %v761_v25 }
  0x21   :  { %654 = vmatprep.subr.mxu0 %v823_v4 }
  0x22   :  { %783 = vmatpush3.bf16.msra.mxu1 %v782_v50 }
  0x23   :  { %652 = vmatmul.mubr.f32.vlgmr.msra.gmra.mrb[0].mxu0 %v35_v26  ;;  %784 = vmatprep.subr.bf16.mxu1 %v821_v0  ;;  %v453_v26 = vld [vmem:[%s1095_s1] sm:$0xff] }
  0x24   :  { %656 = vmatprep.mubr.msk.f32.mxu0 %vm822_vm0, %v823_v4 }
  0x26   :  { %786 = vmatpush3.bf16.msra.mxu1 %v785_v53 }
  0x27   :  { %787 = vmatprep.subr.bf16.mxu1 %v821_v0 }
  0xf6   :  { %v118_v43 = vpop.f32.mrb[0].mxu0 }
  0xf7   :  { %v653_v44 = vpop.f32.mrb[1].mxu0  ;;  %655 = vmatpush3.msra.mxu0 %v118_v43 }
  0xf8   :  { %657 = vmatmul.mubr.msk.f32.vlgmr.msra.gmra.mrb[2].mxu0 %vm129_vm1, %v981_v42  ;;  %694 = vmatprep.subr.mxu0 %v823_v4 }
  0xf9   :  { %696 = vmatprep.mubr.msk.f32.mxu0 %vm822_vm0, %v823_v4 }
 0x1cb   :  { %v199_v55 = vpop.f32.mrb[2].mxu0 }
 0x1cc   :  { %v200_v56 = vadd.f32 %v556_v54, %v199_v55  ;;  %v658_v57 = vpop.f32.mrb[3].mxu0 }
 0x1ce   :  { %817 = vtanh.f32 %v200_v56 }
 0x1d8   :  { %v818_v58 = vpop.eup %817 }
 0x1d9   :  { %692 = vmatmul.mubr.f32.vlgmr.msra.gmra.mrb[0].mxu1 %v818_v58 }
 0x1da   :  { %731 = vmatprep.mubr.msk.f32.mxu1 %vm822_vm0, %v823_v4  ;;  %789 = vmatpush3.bf16.msra.mxu1 %v788_v62 }
 0x1db   :  { %790 = vmatprep.subr.bf16.mxu1 %v821_v0 }
 0x1de   :  { %792 = vmatpush3.bf16.msra.mxu1 %v791_v1 }
 0x1df   :  { %793 = vmatprep.subr.bf16.mxu1 %v821_v0 }
 0x1e2   :  { %795 = vmatpush3.bf16.msra.mxu1 %v794_v5 }
 0x1e3   :  { %796 = vmatprep.subr.bf16.mxu1 %v821_v0 }
 0x1e6   :  { %798 = vmatpush3.bf16.msra.mxu1 %v797_v8 }
 0x1e7   :  { %799 = vmatprep.subr.bf16.mxu1 %v821_v0 }
 0x1ea   :  { %801 = vmatpush3.bf16.msra.mxu1 %v800_v11 }
 0x1eb   :  { %802 = vmatprep.subr.bf16.mxu1 %v821_v0 }
 0x1ee   :  { %804 = vmatpush3.bf16.msra.mxu1 %v803_v14 }
 0x1ef   :  { %805 = vmatprep.subr.bf16.mxu1 %v821_v0 }
 0x1f2   :  { %807 = vmatpush3.bf16.msra.mxu1 %v806_v17 }
 0x1f3   :  { %808 = vmatprep.subr.bf16.mxu1 %v821_v0  ;;  %v809_v0 = vpack.c.bf16 %v382_v21, %v381_v20 }
 0x1f6   :  { %810 = vmatpush3.bf16.msra.mxu1 %v809_v0 }
 0x2ac   :  { %v286_v18 = vpop.f32.mrb[0].mxu1 }
 0x2ad   :  { %v693_v19 = vpop.f32.mrb[1].mxu1  ;;  %695 = vmatpush3.msra.mxu0 %v286_v18 }
 0x2ae   :  { %697 = vmatmul.mubr.msk.f32.vlgmr.msra.gmra.mrb[4].mxu0 %vm129_vm1, %v981_v42  ;;  %734 = vmatprep.subr.mxu0 %v823_v4 }
 0x2af   :  { %736 = vmatprep.mubr.msk.f32.mxu0 %vm822_vm0, %v823_v4  ;;  %v14_v4 = vstv %s1094_s8 }
 0x2b0   :  { %15 = vst [vmem:[#allocation2] sm:$0x1] %v14_v4 }
 0x2b7   :  { %v561_v32 = vld [vmem:[#allocation2] ss:$0 sm:$0xff] }
 0x381   :  { %v363_v23 = vpop.f32.mrb[4].mxu0 }
 0x382   :  { %v364_v24 = vadd.f32 %v558_v22, %v363_v23  ;;  %v698_v25 = vpop.f32.mrb[5].mxu0 }
 0x384   :  { %732 = vmatmul.mubr.f32.vlgmr.msra.gmra.mrb[2].mxu1 %v364_v24 }
 0x457   :  { %v449_v27 = vpop.f32.mrb[2].mxu1 }
 0x458   :  { %528 = vrot.lane.b32.xlu0 %v449_v27, %s824_s7  ;;  %v733_v28 = vpop.f32.mrb[3].mxu1  ;;  %735 = vmatpush3.msra.mxu0 %v449_v27 }
 0x459   :  { %737 = vmatmul.mubr.msk.f32.vlgmr.msra.gmra.mrb[6].mxu0 %vm129_vm1, %v453_v26 }
 0x4ca   :  { %v529_v30 = vpop.permute.xlu0 %528 }
 0x52c   :  { %v523_v31 = vpop.f32.mrb[6].mxu0 }
 0x52d   :  { %v531_v33 = vadd.f32 %v529_v30, %v523_v31  ;;  %v738_v34 = vpop.f32.mrb[7].mxu0 }
 0x52f   :  { %v539_v35 = vadd.f32 %v561_v32, %v531_v33 }
 0x531   :  { %819 = vtanh.f32 %v539_v35 }
 0x53b   :  { %v820_v36 = vpop.eup %819 }
 0x53c   :  { %546 = vperm.xlu0 %816, %v820_v36  }
 0x5bb   :  { %v547_v39 = vpop.permute.xlu0 %546 }
 0x5bc   :  { %v549_v40 = vsel %vm543_vm2, %v547_v39, 0.0 }
 0x5bd   :  { %v550_v41 = vadd.f32 %v549_v40, %v364_v24 }
 0x5bf   :  { %551 = vst [vmem:[%s1096_s9] sm:$0xff] %v550_v41 }

</bundles_post_ra>
